<compile_context>
chip_gen: v7x
topology: tpu7x:2x2x1
jax: 0.10.0
libtpu: 0.0.40
codegen_flags: <defaults>
</compile_context>

<pallas_src>
import functools

import jax
import jax.numpy as jnp
from jax.experimental import pallas as pl
from jax.experimental.pallas import tpu as pltpu

_LANE = 128            # last-dim (lane) alignment
_SUB = 8               # sublane alignment (f32 / time axis granularity)
_SUB_BF16 = 16         # sublane alignment for bf16 second-minor dims
_MXU_DTYPE = jnp.bfloat16


def _round_up(x, m):
    return (x + m - 1) // m * m


def _vmem_limit_bytes():
    """Generation-aware VMEM limit for the pallas_call compiler params."""
    try:
        cap = int(getattr(pltpu.get_tpu_info(), "vmem_capacity_bytes"))
    except Exception:
        cap = 64 * 1024 * 1024          # conservative fallback (v7x-sized)
    if cap >= 128 * 1024 * 1024:
        return 96 * 1024 * 1024         # v5e / v6e (128 MiB per TensorCore)
    return 48 * 1024 * 1024             # v7x (64 MiB per TensorCore)


# ---------------------------------------------------------------------------
# LSTM recurrence kernel: one (batch block, sequence chunk) per grid step
# ---------------------------------------------------------------------------
def _lstm_chunk_kernel(gi_ref, whh_ref, b_ref, h_out_ref, h_st, c_st, *, unroll):
    """gi_ref:  (T, Bblk, 4Hp) bf16  precomputed x @ W_ih (no bias)
       whh_ref: (Hp, 4Hp)      bf16  hidden->gate weights (resident across chunks)
       b_ref:   (1, 4Hp)       f32   combined b_ih + b_hh (added in f32 here)
       h_out:   (T, Bblk, Hp)  bf16  hidden states for this chunk
       h_st/c_st: (Bblk, Hp)   f32   VMEM scratch carried across the chunk axis."""
    t_chunk = gi_ref.shape[0]
    bblk, hp = h_st.shape

    @pl.when(pl.program_id(1) == 0)            # first chunk of this batch block
    def _():
        h_st[...] = jnp.zeros((bblk, hp), jnp.float32)
        c_st[...] = jnp.zeros((bblk, hp), jnp.float32)

    bias = jnp.broadcast_to(b_ref[...], (bblk, 4 * hp))   # f32, hoisted out of the loop

    def step(t, carry):
        h_prev = h_st[...]
        gates = (gi_ref[t].astype(jnp.float32) + bias
                 + jnp.dot(h_prev.astype(whh_ref.dtype), whh_ref[...],
                           preferred_element_type=jnp.float32))
        # PyTorch gate order: i, f, g, o ; each slice starts on a 128-lane boundary.
        i_g = jax.nn.sigmoid(gates[:, 0 * hp:1 * hp])
        f_g = jax.nn.sigmoid(gates[:, 1 * hp:2 * hp])
        g_g = jnp.tanh(gates[:, 2 * hp:3 * hp])
        o_g = jax.nn.sigmoid(gates[:, 3 * hp:4 * hp])
        c_new = f_g * c_st[...] + i_g * g_g
        h_new = o_g * jnp.tanh(c_new)
        c_st[...] = c_new
        h_st[...] = h_new
        h_out_ref[t] = h_new.astype(h_out_ref.dtype)
        return carry

    jax.lax.fori_loop(0, t_chunk, step, 0, unroll=unroll)


def lstm_recurrence(gates_in, w_hh, bias, t_chunk, bblk, unroll, vmem_limit):
    """gates_in: (S_pad, Bp, 4Hp) bf16 ; w_hh: (Hp, 4Hp) bf16 ; bias: (1, 4Hp) f32
       -> (S_pad, Bp, Hp) bf16."""
    s_pad, bp, g4 = gates_in.shape
    hp = g4 // 4
    n_chunks = s_pad // t_chunk
    n_bblk = bp // bblk
    kernel = functools.partial(_lstm_chunk_kernel, unroll=unroll)
    return pl.pallas_call(
        kernel,
        out_shape=jax.ShapeDtypeStruct((s_pad, bp, hp), jnp.bfloat16),
        grid_spec=pltpu.PrefetchScalarGridSpec(
            num_scalar_prefetch=0,
            grid=(n_bblk, n_chunks),
            in_specs=[
                pl.BlockSpec((t_chunk, bblk, g4), lambda b, c: (c, b, 0)),  # bf16 gi stream
                pl.BlockSpec((hp, g4), lambda b, c: (0, 0)),                # resident W_hh
                pl.BlockSpec((1, g4), lambda b, c: (0, 0)),                 # f32 bias
            ],
            out_specs=pl.BlockSpec((t_chunk, bblk, hp), lambda b, c: (c, b, 0)),
            scratch_shapes=[
                pltpu.VMEM((bblk, hp), jnp.float32),     # h state
                pltpu.VMEM((bblk, hp), jnp.float32),     # c state
            ],
        ),
        compiler_params=pltpu.CompilerParams(
            # TODO(synk): switch the batch axis to CORE_PARALLEL once verified on v7x.
            dimension_semantics=("parallel", "arbitrary"),
            vmem_limit_bytes=vmem_limit),
    )(gates_in, w_hh, bias)


# ---------------------------------------------------------------------------
# Output projection + log_softmax
#   fused path : resident W_out, full-vocab block, log-softmax in-kernel
#   tiled path : vocab-tiled, online logsumexp scratch, normalize in XLA
# ---------------------------------------------------------------------------
def _output_fused_kernel(h_ref, w_ref, b_ref, out_ref, *, vocab, return_logits):
    logits = jnp.dot(h_ref[...], w_ref[...],
                     preferred_element_type=jnp.float32) + b_ref[...]
    if return_logits:
        out_ref[...] = logits
    else:
        if logits.shape[-1] != vocab:                    # mask padded vocab lanes
            col = jax.lax.broadcasted_iota(jnp.int32, logits.shape, 1)
            logits = jnp.where(col < vocab, logits, -jnp.inf)
        m = jnp.max(logits, axis=-1, keepdims=True)
        z = logits - m
        lse = jnp.log(jnp.sum(jnp.exp(z), axis=-1, keepdims=True))
        out_ref[...] = z - lse


def _output_tiled_kernel(h_ref, w_ref, b_ref, logits_ref, lse_ref, m_sc, l_sc,
                         *, vocab, v_tile):
    v = pl.program_id(1)

    @pl.when(v == 0)
    def _():
        m_sc[...] = jnp.full(m_sc.shape, -jnp.inf, jnp.float32)
        l_sc[...] = jnp.zeros(l_sc.shape, jnp.float32)

    logits = jnp.dot(h_ref[...], w_ref[...],
                     preferred_element_type=jnp.float32) + b_ref[...]
    col = jax.lax.broadcasted_iota(jnp.int32, logits.shape, 1) + v * v_tile
    masked = jnp.where(col < vocab, logits, -jnp.inf)
    logits_ref[...] = masked

    m_old = m_sc[...]
    m_new = jnp.maximum(m_old, jnp.max(masked, axis=-1, keepdims=True))
    l_sc[...] = (l_sc[...] * jnp.exp(m_old - m_new)
                 + jnp.sum(jnp.exp(masked - m_new), axis=-1, keepdims=True))
    m_sc[...] = m_new

    @pl.when(v == pl.num_programs(1) - 1)
    def _():
        lse_ref[...] = m_sc[...] + jnp.log(l_sc[...])


def output_projection_fused(h_rows, w_out, b_out, vocab, return_logits, row_tile,
                            vmem_limit):
    n_pad, hp = h_rows.shape
    vp = w_out.shape[1]
    kernel = functools.partial(_output_fused_kernel, vocab=vocab,
                               return_logits=return_logits)
    return pl.pallas_call(
        kernel,
        out_shape=jax.ShapeDtypeStruct((n_pad, vp), jnp.float32),
        grid_spec=pltpu.PrefetchScalarGridSpec(
            num_scalar_prefetch=0,
            grid=(n_pad // row_tile,),
            in_specs=[
                pl.BlockSpec((row_tile, hp), lambda i: (i, 0)),
                pl.BlockSpec((hp, vp), lambda i: (0, 0)),       # resident W_out (bf16)
                pl.BlockSpec((1, vp), lambda i: (0, 0)),
            ],
            out_specs=pl.BlockSpec((row_tile, vp), lambda i: (i, 0)),
        ),
        compiler_params=pltpu.CompilerParams(
            dimension_semantics=("parallel",),
            vmem_limit_bytes=vmem_limit),
    )(h_rows, w_out, b_out)


def output_projection_tiled(h_rows, w_out, b_out, vocab, row_tile, v_tile, vmem_limit):
    n_pad, hp = h_rows.shape
    vp = w_out.shape[1]
    kernel = functools.partial(_output_tiled_kernel, vocab=vocab, v_tile=v_tile)
    return pl.pallas_call(
        kernel,
        out_shape=(jax.ShapeDtypeStruct((n_pad, vp), jnp.float32),
                   jax.ShapeDtypeStruct((n_pad, 1), jnp.float32)),
        grid_spec=pltpu.PrefetchScalarGridSpec(
            num_scalar_prefetch=0,
            grid=(n_pad // row_tile, vp // v_tile),
            in_specs=[
                pl.BlockSpec((row_tile, hp), lambda i, v: (i, 0)),
                pl.BlockSpec((hp, v_tile), lambda i, v: (0, v)),   # W_out streamed per tile
                pl.BlockSpec((1, v_tile), lambda i, v: (0, v)),
            ],
            out_specs=(pl.BlockSpec((row_tile, v_tile), lambda i, v: (i, v)),
                       pl.BlockSpec((row_tile, 1), lambda i, v: (i, 0))),
            scratch_shapes=[pltpu.VMEM((row_tile, 1), jnp.float32),   # running max
                            pltpu.VMEM((row_tile, 1), jnp.float32)],  # running sum
        ),
        compiler_params=pltpu.CompilerParams(
            dimension_semantics=("parallel", "arbitrary"),
            vmem_limit_bytes=vmem_limit),
    )(h_rows, w_out, b_out)


# ---------------------------------------------------------------------------
# VMEM-budgeted planning
# ---------------------------------------------------------------------------
def _pick_t_chunk(seq, bblk, hp, budget, cap):
    cap = max(_SUB, (min(256, cap) // _SUB) * _SUB)
    t = min(cap, _round_up(seq, _SUB))

    def need(tc):
        return (2 * tc * bblk * 4 * hp * 2      # gi bf16 (double-buffered)
                + 2 * tc * bblk * hp * 2        # h_out bf16 (double-buffered)
                + 2 * hp * 4 * hp * 2           # resident W_hh bf16
                + 2 * 4 * hp * 4                # f32 bias
                + 2 * bblk * hp * 4)            # h/c f32 scratch

    while t > _SUB and need(t) > budget:
        t = max(_SUB, _round_up(t // 2, _SUB))
    return t


def _plan_output(n_rows, hp, vp, budget):
    rt_cap = min(512, _round_up(n_rows, _SUB_BF16))

    def fused_need(rt):
        return (2 * hp * vp * 2 + 2 * vp * 4           # resident W_out + bias
                + 2 * rt * hp * 2 + 2 * rt * vp * 4)   # h in (bf16) + f32 out block

    rt = rt_cap
    while rt > _SUB_BF16 and fused_need(rt) > budget:
        rt = max(_SUB_BF16, _round_up(rt // 2, _SUB_BF16))
    if fused_need(rt) <= budget and rt >= min(rt_cap, 128):
        return "fused", rt, vp

    # vocab-tiled path: v_tile = largest multiple of 128 (<= 4096) dividing vp
    vt = _LANE
    for k in range(min(vp // _LANE, 4096 // _LANE), 0, -1):
        if (vp // _LANE) % k == 0:
            vt = k * _LANE
            break

    def tiled_need(rt):
        return (2 * hp * vt * 2 + 2 * vt * 4
                + 2 * rt * hp * 2 + 2 * rt * vt * 4
                + 4 * rt * _LANE * 4)                  # lse out + m/l scratch (padded)

    rt = rt_cap
    while rt > _SUB_BF16 and tiled_need(rt) > budget:
        rt = max(_SUB_BF16, _round_up(rt // 2, _SUB_BF16))
    return "tiled", rt, vt


# ---------------------------------------------------------------------------
# Full LM forward (matches PyTorch LM.forward, eval mode)
# ---------------------------------------------------------------------------
def lm_forward(prepared, tokens, logits=False, output_mode=None, v_tile=None,
               max_t_chunk=256):
    B, S = tokens.shape
    hp = prepared["hidden_pad"]
    V = prepared["vocab"]
    vp = prepared["w_out"].shape[1]

    vmem_limit = _vmem_limit_bytes()
    budget = int(0.8 * vmem_limit)

    # Batch padding / blocking (batch block axis -> v7x's 2nd TensorCore).
    bp = _round_up(B, _SUB_BF16)
    n_bblk = 2 if bp % (2 * _SUB_BF16) == 0 else 1
    bblk = bp // n_bblk

    t_chunk = _pick_t_chunk(S, bblk, hp, budget, max_t_chunk)
    s_pad = _round_up(S, t_chunk)
    unroll = min(8, t_chunk)

    # Embedding gathered directly in time-major order (folds permute(1,0,2)).
    emb = jnp.take(prepared["embedding"], tokens.T, axis=0)             # (S, B, E) f32
    E = emb.shape[-1]
    x = jnp.zeros((s_pad, bp, E), jnp.bfloat16).at[:S, :B].set(emb.astype(jnp.bfloat16))

    for layer in prepared["lstm"]:
        in_dim = x.shape[-1]
        # Hoisted input projection: one big bf16 MXU GEMM (f32 accumulation) in XLA.
        g_raw = jax.lax.dot_general(
            x.reshape(s_pad * bp, in_dim), layer["w_ih"],
            dimension_numbers=(((1,), (0,)), ((), ())),
            preferred_element_type=jnp.float32)
        g_in = g_raw.astype(jnp.bfloat16).reshape(s_pad, bp, 4 * hp)
        x = lstm_recurrence(g_in, layer["w_hh"], layer["b"],
                            t_chunk, bblk, unroll, vmem_limit)           # (s_pad, bp, hp) bf16
        # TODO(synk): inter-layer dropout omitted (identity in eval mode).

    # Back to batch-major (same place PyTorch permutes) — bf16, so half the traffic.
    # TODO(synk): fold this permute into the projection's index_map to save an HBM pass.
    n_rows = B * S
    h_bm = jnp.transpose(x[:S, :B], (1, 0, 2)).reshape(n_rows, hp)       # (B*S, Hp) bf16

    mode, row_tile, vt = _plan_output(n_rows, hp, vp, budget)
    if output_mode is not None:
        mode = output_mode
    if v_tile is not None:
        vt = v_tile

    n_pad = _round_up(n_rows, row_tile)
    h_rows = jnp.zeros((n_pad, hp), jnp.bfloat16).at[:n_rows].set(h_bm)

    if mode == "fused":
        out = output_projection_fused(h_rows, prepared["w_out"], prepared["b_out"],
                                      V, logits, row_tile, vmem_limit)
        out = out[:n_rows, :V]
    else:
        lg, lse = output_projection_tiled(h_rows, prepared["w_out"], prepared["b_out"],
                                          V, row_tile, vt, vmem_limit)
        lg = lg[:n_rows, :V]
        out = lg if logits else lg - lse[:n_rows]
    return out.reshape(B, S, V)


# ---------------------------------------------------------------------------
# Parameters: PyTorch-like init + padded/cast versions for the Pallas path
# ---------------------------------------------------------------------------
def init_params(key, vocab_size, embed_size, hidden_dim, num_layers):
    keys = jax.random.split(key, 3 + 4 * num_layers)
    k_emb, k_wout, k_bout = keys[0], keys[1], keys[2]
    bound = 1.0 / jnp.sqrt(hidden_dim)
    params = {
        "embedding": jax.random.normal(k_emb, (vocab_size, embed_size), jnp.float32) * 0.1,
        "w_out": jax.random.uniform(k_wout, (hidden_dim, vocab_size), jnp.float32, -bound, bound),
        "b_out": jax.random.uniform(k_bout, (1, vocab_size), jnp.float32, -bound, bound),
        "lstm": [],
    }
    for layer in range(num_layers):
        in_size = embed_size if layer == 0 else hidden_dim
        k0, k1, k2, k3 = keys[3 + 4 * layer: 3 + 4 * (layer + 1)]
        w_ih = jax.random.uniform(k0, (in_size, 4 * hidden_dim), jnp.float32, -bound, bound)
        w_hh = jax.random.uniform(k1, (hidden_dim, 4 * hidden_dim), jnp.float32, -bound, bound)
        b_ih = jax.random.uniform(k2, (1, 4 * hidden_dim), jnp.float32, -bound, bound)
        b_hh = jax.random.uniform(k3, (1, 4 * hidden_dim), jnp.float32, -bound, bound)
        params["lstm"].append({"w_ih": w_ih, "w_hh": w_hh, "b": b_ih + b_hh})
    return params


def prepare_params(params, hidden_dim):
    """Pad H/V to lane multiples, put each gate on a 128-lane boundary, cast MXU weights."""
    H = hidden_dim
    hp = _round_up(H, _LANE)
    V = params["w_out"].shape[1]
    vp = _round_up(V, _LANE)

    def gate_pad(m, rows_to):
        out = jnp.zeros((rows_to, 4 * hp), jnp.float32)
        for g in range(4):
            out = out.at[:m.shape[0], g * hp:g * hp + H].set(m[:, g * H:(g + 1) * H])
        return out

    lstm_p = []
    for li, layer in enumerate(params["lstm"]):
        in_dim = layer["w_ih"].shape[0]
        in_pad = in_dim if li == 0 else hp
        lstm_p.append({
            "w_ih": gate_pad(layer["w_ih"], in_pad).astype(_MXU_DTYPE),   # bf16 (XLA GEMM)
            "w_hh": gate_pad(layer["w_hh"], hp).astype(_MXU_DTYPE),       # bf16 (in-kernel)
            "b": gate_pad(layer["b"], 1),                                 # f32 combined bias
        })

    w_out = jnp.zeros((hp, vp), jnp.float32).at[:H, :V].set(params["w_out"]).astype(_MXU_DTYPE)
    b_out = jnp.zeros((1, vp), jnp.float32).at[:, :V].set(params["b_out"])
    return {"embedding": params["embedding"], "lstm": lstm_p,
            "w_out": w_out, "b_out": b_out, "hidden_pad": hp, "vocab": V}


# ---------------------------------------------------------------------------
# Pure-JAX f32 reference (for correctness checking only)
# ---------------------------------------------------------------------------
def lm_forward_ref(params, tokens, logits=False):
    emb = params["embedding"][tokens]                    # (B, S, E)
    x = jnp.transpose(emb, (1, 0, 2))                    # (S, B, E)
    for layer in params["lstm"]:
        w_ih, w_hh, b = layer["w_ih"], layer["w_hh"], layer["b"]
        H = w_hh.shape[0]
        Bsz = x.shape[1]

        def step(carry, x_t):
            h, c = carry
            gates = x_t @ w_ih + h @ w_hh + b[0]
            i = jax.nn.sigmoid(gates[:, :H])
            f = jax.nn.sigmoid(gates[:, H:2 * H])
            g = jnp.tanh(gates[:, 2 * H:3 * H])
            o = jax.nn.sigmoid(gates[:, 3 * H:])
            c = f * c + i * g
            h = o * jnp.tanh(c)
            return (h, c), h

        init = (jnp.zeros((Bsz, H), jnp.float32), jnp.zeros((Bsz, H), jnp.float32))
        _, x = jax.lax.scan(step, init, x)
    h_all = jnp.transpose(x, (1, 0, 2))                  # (B, S, H)
    out = h_all @ params["w_out"] + params["b_out"]
    return out if logits else jax.nn.log_softmax(out, axis=-1)


if __name__ == "__main__":
    # --- Test 1: spec-sized config; exercises the fused output path ---------
    vocab_size, embed_size, hidden_dim = 32, 16, 32
    num_layers = 2
    batch, seq = 2, 8

    key = jax.random.PRNGKey(0)
    k_params, k_tok, k_params2, k_tok2 = jax.random.split(key, 4)
    params = init_params(k_params, vocab_size, embed_size, hidden_dim, num_layers)
    prepared = prepare_params(params, hidden_dim)
    tokens = jax.random.randint(k_tok, (batch, seq), 0, vocab_size, jnp.int32)

    log_probs = lm_forward(prepared, tokens, logits=False)
    jax.block_until_ready(log_probs)
    assert log_probs.shape == (batch, seq, vocab_size)

    row_sums = jnp.exp(log_probs).sum(axis=-1)
    assert bool(jnp.all(jnp.abs(row_sums - 1.0) < 1e-3))

    ref_lp = lm_forward_ref(params, tokens, logits=False)
    assert bool(jnp.max(jnp.abs(log_probs - ref_lp)) < 5e-2)

    logits_out = lm_forward(prepared, tokens, logits=True)
    jax.block_until_ready(logits_out)
    assert logits_out.shape == (batch, seq, vocab_size)
    ref_logits = lm_forward_ref(params, tokens, logits=True)
    assert bool(jnp.max(jnp.abs(logits_out - ref_logits)) < 5e-2)

    # --- Test 2: multi-chunk recurrence, batch-block grid axis, vocab-tiled
    #             online-logsumexp output path --------------------------------
    vocab2, embed2, hidden2 = 300, 16, 32
    batch2, seq2 = 32, 24
    params2 = init_params(k_params2, vocab2, embed2, hidden2, num_layers)
    prepared2 = prepare_params(params2, hidden2)
    tokens2 = jax.random.randint(k_tok2, (batch2, seq2), 0, vocab2, jnp.int32)

    lp2 = lm_forward(prepared2, tokens2, logits=False,
                     output_mode="tiled", v_tile=128, max_t_chunk=8)
    jax.block_until_ready(lp2)
    assert lp2.shape == (batch2, seq2, vocab2)
    rs2 = jnp.exp(lp2).sum(axis=-1)
    assert bool(jnp.all(jnp.abs(rs2 - 1.0) < 1e-3))
    ref2 = lm_forward_ref(params2, tokens2, logits=False)
    assert bool(jnp.max(jnp.abs(lp2 - ref2)) < 7e-2)

    print("KERNEL_OK")
</pallas_src>

<mosaic_0001>
module attributes {stable_mosaic.version = 11 : i64} {
  func.func @_lstm_chunk_kernel(%arg0: i32, %arg1: i32, %arg2: memref<8x16x512xbf16, #tpu.memory_space<vmem>>, %arg3: memref<128x512xbf16, #tpu.memory_space<vmem>>, %arg4: memref<1x512xf32, #tpu.memory_space<vmem>>, %arg5: memref<8x16x128xbf16, #tpu.memory_space<vmem>>, %arg6: memref<16x128xf32, #tpu.memory_space<vmem>>, %arg7: memref<16x128xf32, #tpu.memory_space<vmem>>) attributes {dimension_semantics = [#tpu.dimension_semantics<parallel>, #tpu.dimension_semantics<arbitrary>], iteration_bounds = array<i64: 1, 1>, scalar_prefetch = 0 : i64, scratch_operands = 2 : i64, tpu.core_type = #tpu.core_type<tc>, window_params = [{transform_indices = @transform_0, window_bounds = array<i64: 8, 16, 512>}, {pipeline_mode = #tpu.pipeline_mode<synchronous>, transform_indices = @transform_1, window_bounds = array<i64: 128, 512>}, {pipeline_mode = #tpu.pipeline_mode<synchronous>, transform_indices = @transform_2, window_bounds = array<i64: 1, 512>}, {transform_indices = @transform_3, window_bounds = array<i64: 8, 16, 128>}]} {
    %c0_i32 = arith.constant 0 : i32
    %0 = arith.cmpi eq, %arg1, %c0_i32 : i32
    %1 = arith.extui %0 : i1 to i32
    %c0_i32_0 = arith.constant 0 : i32
    %2 = arith.cmpi ne, %1, %c0_i32_0 : i32
    scf.if %2 {
      %cst_146 = arith.constant 0.000000e+00 : f32
      %350 = vector.broadcast %cst_146 : f32 to vector<16x128xf32>
      %c0_147 = arith.constant 0 : index
      %c0_148 = arith.constant 0 : index
      %351 = vector.load %arg6[%c0_147, %c0_148] : memref<16x128xf32, #tpu.memory_space<vmem>>, vector<16x128xf32>
      tpu.vector_store %arg6[%c0_147, %c0_148], %350 {strides = array<i32>} : memref<16x128xf32, #tpu.memory_space<vmem>>, vector<16x128xf32>,
      %cst_149 = arith.constant 0.000000e+00 : f32
      %352 = vector.broadcast %cst_149 : f32 to vector<16x128xf32>
      %c0_150 = arith.constant 0 : index
      %c0_151 = arith.constant 0 : index
      %353 = vector.load %arg7[%c0_150, %c0_151] : memref<16x128xf32, #tpu.memory_space<vmem>>, vector<16x128xf32>
      tpu.vector_store %arg7[%c0_150, %c0_151], %352 {strides = array<i32>} : memref<16x128xf32, #tpu.memory_space<vmem>>, vector<16x128xf32>,
    } else {
    }
    %c0 = arith.constant 0 : index
    %c0_1 = arith.constant 0 : index
    %3 = vector.load %arg4[%c0, %c0_1] : memref<1x512xf32, #tpu.memory_space<vmem>>, vector<1x512xf32>
    %4 = vector.shape_cast %3 : vector<1x512xf32> to vector<1x512xf32>
    %5 = vector.broadcast %4 : vector<1x512xf32> to vector<16x512xf32>
    %c0_i32_2 = arith.constant 0 : i32
    %c0_3 = arith.constant 0 : index
    %c0_4 = arith.constant 0 : index
    %6 = vector.load %arg6[%c0_3, %c0_4] : memref<16x128xf32, #tpu.memory_space<vmem>>, vector<16x128xf32>
    %7 = arith.index_cast %c0_i32_2 : i32 to index
    %c0_5 = arith.constant 0 : index
    %c0_6 = arith.constant 0 : index
    %8 = vector.load %arg2[%7, %c0_5, %c0_6] : memref<8x16x512xbf16, #tpu.memory_space<vmem>>, vector<1x16x512xbf16>
    %9 = vector.shape_cast %8 : vector<1x16x512xbf16> to vector<16x512xbf16>
    %10 = arith.extf %9 : vector<16x512xbf16> to vector<16x512xf32>
    %11 = arith.addf %10, %5 : vector<16x512xf32>
    %12 = arith.truncf %6 : vector<16x128xf32> to vector<16x128xbf16>
    %c0_7 = arith.constant 0 : index
    %c0_8 = arith.constant 0 : index
    %13 = vector.load %arg3[%c0_7, %c0_8] : memref<128x512xbf16, #tpu.memory_space<vmem>>, vector<128x512xbf16>
    %cst = arith.constant dense<0.000000e+00> : vector<16x512xf32>
    %14 = tpu.matmul %12, %13, %cst {dimension_numbers = #tpu.dot_dimension_numbers<[1], [0], [0], [1], [0, 0, 1, 1], [], []>} : vector<16x128xbf16>, vector<128x512xbf16>, vector<16x512xf32> -> vector<16x512xf32>
    %15 = arith.addf %11, %14 : vector<16x512xf32>
    %16 = vector.extract_strided_slice %15 {offsets = [0, 0], sizes = [16, 128], strides = [1, 1]} : vector<16x512xf32> to vector<16x128xf32>
    %17 = arith.negf %16 : vector<16x128xf32>
    %18 = math.exp %17 : vector<16x128xf32>
    %cst_9 = arith.constant 1.000000e+00 : f32
    %19 = vector.broadcast %cst_9 : f32 to vector<16x128xf32>
    %20 = arith.addf %19, %18 : vector<16x128xf32>
    %21 = arith.divf %19, %20 : vector<16x128xf32>
    %22 = vector.extract_strided_slice %15 {offsets = [0, 128], sizes = [16, 128], strides = [1, 1]} : vector<16x512xf32> to vector<16x128xf32>
    %23 = arith.negf %22 : vector<16x128xf32>
    %24 = math.exp %23 : vector<16x128xf32>
    %cst_10 = arith.constant 1.000000e+00 : f32
    %25 = vector.broadcast %cst_10 : f32 to vector<16x128xf32>
    %26 = arith.addf %25, %24 : vector<16x128xf32>
    %27 = arith.divf %25, %26 : vector<16x128xf32>
    %28 = vector.extract_strided_slice %15 {offsets = [0, 256], sizes = [16, 128], strides = [1, 1]} : vector<16x512xf32> to vector<16x128xf32>
    %29 = math.tanh %28 : vector<16x128xf32>
    %30 = vector.extract_strided_slice %15 {offsets = [0, 384], sizes = [16, 128], strides = [1, 1]} : vector<16x512xf32> to vector<16x128xf32>
    %31 = arith.negf %30 : vector<16x128xf32>
    %32 = math.exp %31 : vector<16x128xf32>
    %cst_11 = arith.constant 1.000000e+00 : f32
    %33 = vector.broadcast %cst_11 : f32 to vector<16x128xf32>
    %34 = arith.addf %33, %32 : vector<16x128xf32>
    %35 = arith.divf %33, %34 : vector<16x128xf32>
    %c0_12 = arith.constant 0 : index
    %c0_13 = arith.constant 0 : index
    %36 = vector.load %arg7[%c0_12, %c0_13] : memref<16x128xf32, #tpu.memory_space<vmem>>, vector<16x128xf32>
    %37 = arith.mulf %27, %36 : vector<16x128xf32>
    %38 = arith.mulf %21, %29 : vector<16x128xf32>
    %39 = arith.addf %37, %38 : vector<16x128xf32>
    %40 = math.tanh %39 : vector<16x128xf32>
    %41 = arith.mulf %35, %40 : vector<16x128xf32>
    %c0_14 = arith.constant 0 : index
    %c0_15 = arith.constant 0 : index
    %42 = vector.load %arg7[%c0_14, %c0_15] : memref<16x128xf32, #tpu.memory_space<vmem>>, vector<16x128xf32>
    tpu.vector_store %arg7[%c0_14, %c0_15], %39 {strides = array<i32>} : memref<16x128xf32, #tpu.memory_space<vmem>>, vector<16x128xf32>,
    %c0_16 = arith.constant 0 : index
    %c0_17 = arith.constant 0 : index
    %43 = vector.load %arg6[%c0_16, %c0_17] : memref<16x128xf32, #tpu.memory_space<vmem>>, vector<16x128xf32>
    tpu.vector_store %arg6[%c0_16, %c0_17], %41 {strides = array<i32>} : memref<16x128xf32, #tpu.memory_space<vmem>>, vector<16x128xf32>,
    %44 = arith.truncf %41 : vector<16x128xf32> to vector<16x128xbf16>
    %45 = arith.index_cast %c0_i32_2 : i32 to index
    %c0_18 = arith.constant 0 : index
    %c0_19 = arith.constant 0 : index
    %46 = vector.load %arg5[%45, %c0_18, %c0_19] : memref<8x16x128xbf16, #tpu.memory_space<vmem>>, vector<1x16x128xbf16>
    %47 = vector.shape_cast %46 : vector<1x16x128xbf16> to vector<16x128xbf16>
    %48 = vector.shape_cast %44 : vector<16x128xbf16> to vector<1x16x128xbf16>
    tpu.vector_store %arg5[%45, %c0_18, %c0_19], %48 {strides = array<i32>} : memref<8x16x128xbf16, #tpu.memory_space<vmem>>, vector<1x16x128xbf16>,
    %c1_i32 = arith.constant 1 : i32
    %c0_20 = arith.constant 0 : index
    %c0_21 = arith.constant 0 : index
    %49 = vector.load %arg6[%c0_20, %c0_21] : memref<16x128xf32, #tpu.memory_space<vmem>>, vector<16x128xf32>
    %50 = arith.index_cast %c1_i32 : i32 to index
    %c0_22 = arith.constant 0 : index
    %c0_23 = arith.constant 0 : index
    %51 = vector.load %arg2[%50, %c0_22, %c0_23] : memref<8x16x512xbf16, #tpu.memory_space<vmem>>, vector<1x16x512xbf16>
    %52 = vector.shape_cast %51 : vector<1x16x512xbf16> to vector<16x512xbf16>
    %53 = arith.extf %52 : vector<16x512xbf16> to vector<16x512xf32>
    %54 = arith.addf %53, %5 : vector<16x512xf32>
    %55 = arith.truncf %49 : vector<16x128xf32> to vector<16x128xbf16>
    %c0_24 = arith.constant 0 : index
    %c0_25 = arith.constant 0 : index
    %56 = vector.load %arg3[%c0_24, %c0_25] : memref<128x512xbf16, #tpu.memory_space<vmem>>, vector<128x512xbf16>
    %cst_26 = arith.constant dense<0.000000e+00> : vector<16x512xf32>
    %57 = tpu.matmul %55, %56, %cst_26 {dimension_numbers = #tpu.dot_dimension_numbers<[1], [0], [0], [1], [0, 0, 1, 1], [], []>} : vector<16x128xbf16>, vector<128x512xbf16>, vector<16x512xf32> -> vector<16x512xf32>
    %58 = arith.addf %54, %57 : vector<16x512xf32>
    %59 = vector.extract_strided_slice %58 {offsets = [0, 0], sizes = [16, 128], strides = [1, 1]} : vector<16x512xf32> to vector<16x128xf32>
    %60 = arith.negf %59 : vector<16x128xf32>
    %61 = math.exp %60 : vector<16x128xf32>
    %cst_27 = arith.constant 1.000000e+00 : f32
    %62 = vector.broadcast %cst_27 : f32 to vector<16x128xf32>
    %63 = arith.addf %62, %61 : vector<16x128xf32>
    %64 = arith.divf %62, %63 : vector<16x128xf32>
    %65 = vector.extract_strided_slice %58 {offsets = [0, 128], sizes = [16, 128], strides = [1, 1]} : vector<16x512xf32> to vector<16x128xf32>
    %66 = arith.negf %65 : vector<16x128xf32>
    %67 = math.exp %66 : vector<16x128xf32>
    %cst_28 = arith.constant 1.000000e+00 : f32
    %68 = vector.broadcast %cst_28 : f32 to vector<16x128xf32>
    %69 = arith.addf %68, %67 : vector<16x128xf32>
    %70 = arith.divf %68, %69 : vector<16x128xf32>
    %71 = vector.extract_strided_slice %58 {offsets = [0, 256], sizes = [16, 128], strides = [1, 1]} : vector<16x512xf32> to vector<16x128xf32>
    %72 = math.tanh %71 : vector<16x128xf32>
    %73 = vector.extract_strided_slice %58 {offsets = [0, 384], sizes = [16, 128], strides = [1, 1]} : vector<16x512xf32> to vector<16x128xf32>
    %74 = arith.negf %73 : vector<16x128xf32>
    %75 = math.exp %74 : vector<16x128xf32>
    %cst_29 = arith.constant 1.000000e+00 : f32
    %76 = vector.broadcast %cst_29 : f32 to vector<16x128xf32>
    %77 = arith.addf %76, %75 : vector<16x128xf32>
    %78 = arith.divf %76, %77 : vector<16x128xf32>
    %c0_30 = arith.constant 0 : index
    %c0_31 = arith.constant 0 : index
    %79 = vector.load %arg7[%c0_30, %c0_31] : memref<16x128xf32, #tpu.memory_space<vmem>>, vector<16x128xf32>
    %80 = arith.mulf %70, %79 : vector<16x128xf32>
    %81 = arith.mulf %64, %72 : vector<16x128xf32>
    %82 = arith.addf %80, %81 : vector<16x128xf32>
    %83 = math.tanh %82 : vector<16x128xf32>
    %84 = arith.mulf %78, %83 : vector<16x128xf32>
    %c0_32 = arith.constant 0 : index
    %c0_33 = arith.constant 0 : index
    %85 = vector.load %arg7[%c0_32, %c0_33] : memref<16x128xf32, #tpu.memory_space<vmem>>, vector<16x128xf32>
    tpu.vector_store %arg7[%c0_32, %c0_33], %82 {strides = array<i32>} : memref<16x128xf32, #tpu.memory_space<vmem>>, vector<16x128xf32>,
    %c0_34 = arith.constant 0 : index
    %c0_35 = arith.constant 0 : index
    %86 = vector.load %arg6[%c0_34, %c0_35] : memref<16x128xf32, #tpu.memory_space<vmem>>, vector<16x128xf32>
    tpu.vector_store %arg6[%c0_34, %c0_35], %84 {strides = array<i32>} : memref<16x128xf32, #tpu.memory_space<vmem>>, vector<16x128xf32>,
    %87 = arith.truncf %84 : vector<16x128xf32> to vector<16x128xbf16>
    %88 = arith.index_cast %c1_i32 : i32 to index
    %c0_36 = arith.constant 0 : index
    %c0_37 = arith.constant 0 : index
    %89 = vector.load %arg5[%88, %c0_36, %c0_37] : memref<8x16x128xbf16, #tpu.memory_space<vmem>>, vector<1x16x128xbf16>
    %90 = vector.shape_cast %89 : vector<1x16x128xbf16> to vector<16x128xbf16>
    %91 = vector.shape_cast %87 : vector<16x128xbf16> to vector<1x16x128xbf16>
    tpu.vector_store %arg5[%88, %c0_36, %c0_37], %91 {strides = array<i32>} : memref<8x16x128xbf16, #tpu.memory_space<vmem>>, vector<1x16x128xbf16>,
    %c2_i32 = arith.constant 2 : i32
    %c0_38 = arith.constant 0 : index
    %c0_39 = arith.constant 0 : index
    %92 = vector.load %arg6[%c0_38, %c0_39] : memref<16x128xf32, #tpu.memory_space<vmem>>, vector<16x128xf32>
    %93 = arith.index_cast %c2_i32 : i32 to index
    %c0_40 = arith.constant 0 : index
    %c0_41 = arith.constant 0 : index
    %94 = vector.load %arg2[%93, %c0_40, %c0_41] : memref<8x16x512xbf16, #tpu.memory_space<vmem>>, vector<1x16x512xbf16>
    %95 = vector.shape_cast %94 : vector<1x16x512xbf16> to vector<16x512xbf16>
    %96 = arith.extf %95 : vector<16x512xbf16> to vector<16x512xf32>
    %97 = arith.addf %96, %5 : vector<16x512xf32>
    %98 = arith.truncf %92 : vector<16x128xf32> to vector<16x128xbf16>
    %c0_42 = arith.constant 0 : index
    %c0_43 = arith.constant 0 : index
    %99 = vector.load %arg3[%c0_42, %c0_43] : memref<128x512xbf16, #tpu.memory_space<vmem>>, vector<128x512xbf16>
    %cst_44 = arith.constant dense<0.000000e+00> : vector<16x512xf32>
    %100 = tpu.matmul %98, %99, %cst_44 {dimension_numbers = #tpu.dot_dimension_numbers<[1], [0], [0], [1], [0, 0, 1, 1], [], []>} : vector<16x128xbf16>, vector<128x512xbf16>, vector<16x512xf32> -> vector<16x512xf32>
    %101 = arith.addf %97, %100 : vector<16x512xf32>
    %102 = vector.extract_strided_slice %101 {offsets = [0, 0], sizes = [16, 128], strides = [1, 1]} : vector<16x512xf32> to vector<16x128xf32>
    %103 = arith.negf %102 : vector<16x128xf32>
    %104 = math.exp %103 : vector<16x128xf32>
    %cst_45 = arith.constant 1.000000e+00 : f32
    %105 = vector.broadcast %cst_45 : f32 to vector<16x128xf32>
    %106 = arith.addf %105, %104 : vector<16x128xf32>
    %107 = arith.divf %105, %106 : vector<16x128xf32>
    %108 = vector.extract_strided_slice %101 {offsets = [0, 128], sizes = [16, 128], strides = [1, 1]} : vector<16x512xf32> to vector<16x128xf32>
    %109 = arith.negf %108 : vector<16x128xf32>
    %110 = math.exp %109 : vector<16x128xf32>
    %cst_46 = arith.constant 1.000000e+00 : f32
    %111 = vector.broadcast %cst_46 : f32 to vector<16x128xf32>
    %112 = arith.addf %111, %110 : vector<16x128xf32>
    %113 = arith.divf %111, %112 : vector<16x128xf32>
    %114 = vector.extract_strided_slice %101 {offsets = [0, 256], sizes = [16, 128], strides = [1, 1]} : vector<16x512xf32> to vector<16x128xf32>
    %115 = math.tanh %114 : vector<16x128xf32>
    %116 = vector.extract_strided_slice %101 {offsets = [0, 384], sizes = [16, 128], strides = [1, 1]} : vector<16x512xf32> to vector<16x128xf32>
    %117 = arith.negf %116 : vector<16x128xf32>
    %118 = math.exp %117 : vector<16x128xf32>
    %cst_47 = arith.constant 1.000000e+00 : f32
    %119 = vector.broadcast %cst_47 : f32 to vector<16x128xf32>
    %120 = arith.addf %119, %118 : vector<16x128xf32>
    %121 = arith.divf %119, %120 : vector<16x128xf32>
    %c0_48 = arith.constant 0 : index
    %c0_49 = arith.constant 0 : index
    %122 = vector.load %arg7[%c0_48, %c0_49] : memref<16x128xf32, #tpu.memory_space<vmem>>, vector<16x128xf32>
    %123 = arith.mulf %113, %122 : vector<16x128xf32>
    %124 = arith.mulf %107, %115 : vector<16x128xf32>
    %125 = arith.addf %123, %124 : vector<16x128xf32>
    %126 = math.tanh %125 : vector<16x128xf32>
    %127 = arith.mulf %121, %126 : vector<16x128xf32>
    %c0_50 = arith.constant 0 : index
    %c0_51 = arith.constant 0 : index
    %128 = vector.load %arg7[%c0_50, %c0_51] : memref<16x128xf32, #tpu.memory_space<vmem>>, vector<16x128xf32>
    tpu.vector_store %arg7[%c0_50, %c0_51], %125 {strides = array<i32>} : memref<16x128xf32, #tpu.memory_space<vmem>>, vector<16x128xf32>,
    %c0_52 = arith.constant 0 : index
    %c0_53 = arith.constant 0 : index
    %129 = vector.load %arg6[%c0_52, %c0_53] : memref<16x128xf32, #tpu.memory_space<vmem>>, vector<16x128xf32>
    tpu.vector_store %arg6[%c0_52, %c0_53], %127 {strides = array<i32>} : memref<16x128xf32, #tpu.memory_space<vmem>>, vector<16x128xf32>,
    %130 = arith.truncf %127 : vector<16x128xf32> to vector<16x128xbf16>
    %131 = arith.index_cast %c2_i32 : i32 to index
    %c0_54 = arith.constant 0 : index
    %c0_55 = arith.constant 0 : index
    %132 = vector.load %arg5[%131, %c0_54, %c0_55] : memref<8x16x128xbf16, #tpu.memory_space<vmem>>, vector<1x16x128xbf16>
    %133 = vector.shape_cast %132 : vector<1x16x128xbf16> to vector<16x128xbf16>
    %134 = vector.shape_cast %130 : vector<16x128xbf16> to vector<1x16x128xbf16>
    tpu.vector_store %arg5[%131, %c0_54, %c0_55], %134 {strides = array<i32>} : memref<8x16x128xbf16, #tpu.memory_space<vmem>>, vector<1x16x128xbf16>,
    %c3_i32 = arith.constant 3 : i32
    %c0_56 = arith.constant 0 : index
    %c0_57 = arith.constant 0 : index
    %135 = vector.load %arg6[%c0_56, %c0_57] : memref<16x128xf32, #tpu.memory_space<vmem>>, vector<16x128xf32>
    %136 = arith.index_cast %c3_i32 : i32 to index
    %c0_58 = arith.constant 0 : index
    %c0_59 = arith.constant 0 : index
    %137 = vector.load %arg2[%136, %c0_58, %c0_59] : memref<8x16x512xbf16, #tpu.memory_space<vmem>>, vector<1x16x512xbf16>
    %138 = vector.shape_cast %137 : vector<1x16x512xbf16> to vector<16x512xbf16>
    %139 = arith.extf %138 : vector<16x512xbf16> to vector<16x512xf32>
    %140 = arith.addf %139, %5 : vector<16x512xf32>
    %141 = arith.truncf %135 : vector<16x128xf32> to vector<16x128xbf16>
    %c0_60 = arith.constant 0 : index
    %c0_61 = arith.constant 0 : index
    %142 = vector.load %arg3[%c0_60, %c0_61] : memref<128x512xbf16, #tpu.memory_space<vmem>>, vector<128x512xbf16>
    %cst_62 = arith.constant dense<0.000000e+00> : vector<16x512xf32>
    %143 = tpu.matmul %141, %142, %cst_62 {dimension_numbers = #tpu.dot_dimension_numbers<[1], [0], [0], [1], [0, 0, 1, 1], [], []>} : vector<16x128xbf16>, vector<128x512xbf16>, vector<16x512xf32> -> vector<16x512xf32>
    %144 = arith.addf %140, %143 : vector<16x512xf32>
    %145 = vector.extract_strided_slice %144 {offsets = [0, 0], sizes = [16, 128], strides = [1, 1]} : vector<16x512xf32> to vector<16x128xf32>
    %146 = arith.negf %145 : vector<16x128xf32>
    %147 = math.exp %146 : vector<16x128xf32>
    %cst_63 = arith.constant 1.000000e+00 : f32
    %148 = vector.broadcast %cst_63 : f32 to vector<16x128xf32>
    %149 = arith.addf %148, %147 : vector<16x128xf32>
    %150 = arith.divf %148, %149 : vector<16x128xf32>
    %151 = vector.extract_strided_slice %144 {offsets = [0, 128], sizes = [16, 128], strides = [1, 1]} : vector<16x512xf32> to vector<16x128xf32>
    %152 = arith.negf %151 : vector<16x128xf32>
    %153 = math.exp %152 : vector<16x128xf32>
    %cst_64 = arith.constant 1.000000e+00 : f32
    %154 = vector.broadcast %cst_64 : f32 to vector<16x128xf32>
    %155 = arith.addf %154, %153 : vector<16x128xf32>
    %156 = arith.divf %154, %155 : vector<16x128xf32>
    %157 = vector.extract_strided_slice %144 {offsets = [0, 256], sizes = [16, 128], strides = [1, 1]} : vector<16x512xf32> to vector<16x128xf32>
    %158 = math.tanh %157 : vector<16x128xf32>
    %159 = vector.extract_strided_slice %144 {offsets = [0, 384], sizes = [16, 128], strides = [1, 1]} : vector<16x512xf32> to vector<16x128xf32>
    %160 = arith.negf %159 : vector<16x128xf32>
    %161 = math.exp %160 : vector<16x128xf32>
    %cst_65 = arith.constant 1.000000e+00 : f32
    %162 = vector.broadcast %cst_65 : f32 to vector<16x128xf32>
    %163 = arith.addf %162, %161 : vector<16x128xf32>
    %164 = arith.divf %162, %163 : vector<16x128xf32>
    %c0_66 = arith.constant 0 : index
    %c0_67 = arith.constant 0 : index
    %165 = vector.load %arg7[%c0_66, %c0_67] : memref<16x128xf32, #tpu.memory_space<vmem>>, vector<16x128xf32>
    %166 = arith.mulf %156, %165 : vector<16x128xf32>
    %167 = arith.mulf %150, %158 : vector<16x128xf32>
    %168 = arith.addf %166, %167 : vector<16x128xf32>
    %169 = math.tanh %168 : vector<16x128xf32>
    %170 = arith.mulf %164, %169 : vector<16x128xf32>
    %c0_68 = arith.constant 0 : index
    %c0_69 = arith.constant 0 : index
    %171 = vector.load %arg7[%c0_68, %c0_69] : memref<16x128xf32, #tpu.memory_space<vmem>>, vector<16x128xf32>
    tpu.vector_store %arg7[%c0_68, %c0_69], %168 {strides = array<i32>} : memref<16x128xf32, #tpu.memory_space<vmem>>, vector<16x128xf32>,
    %c0_70 = arith.constant 0 : index
    %c0_71 = arith.constant 0 : index
    %172 = vector.load %arg6[%c0_70, %c0_71] : memref<16x128xf32, #tpu.memory_space<vmem>>, vector<16x128xf32>
    tpu.vector_store %arg6[%c0_70, %c0_71], %170 {strides = array<i32>} : memref<16x128xf32, #tpu.memory_space<vmem>>, vector<16x128xf32>,
    %173 = arith.truncf %170 : vector<16x128xf32> to vector<16x128xbf16>
    %174 = arith.index_cast %c3_i32 : i32 to index
    %c0_72 = arith.constant 0 : index
    %c0_73 = arith.constant 0 : index
    %175 = vector.load %arg5[%174, %c0_72, %c0_73] : memref<8x16x128xbf16, #tpu.memory_space<vmem>>, vector<1x16x128xbf16>
    %176 = vector.shape_cast %175 : vector<1x16x128xbf16> to vector<16x128xbf16>
    %177 = vector.shape_cast %173 : vector<16x128xbf16> to vector<1x16x128xbf16>
    tpu.vector_store %arg5[%174, %c0_72, %c0_73], %177 {strides = array<i32>} : memref<8x16x128xbf16, #tpu.memory_space<vmem>>, vector<1x16x128xbf16>,
    %c4_i32 = arith.constant 4 : i32
    %c0_74 = arith.constant 0 : index
    %c0_75 = arith.constant 0 : index
    %178 = vector.load %arg6[%c0_74, %c0_75] : memref<16x128xf32, #tpu.memory_space<vmem>>, vector<16x128xf32>
    %179 = arith.index_cast %c4_i32 : i32 to index
    %c0_76 = arith.constant 0 : index
    %c0_77 = arith.constant 0 : index
    %180 = vector.load %arg2[%179, %c0_76, %c0_77] : memref<8x16x512xbf16, #tpu.memory_space<vmem>>, vector<1x16x512xbf16>
    %181 = vector.shape_cast %180 : vector<1x16x512xbf16> to vector<16x512xbf16>
    %182 = arith.extf %181 : vector<16x512xbf16> to vector<16x512xf32>
    %183 = arith.addf %182, %5 : vector<16x512xf32>
    %184 = arith.truncf %178 : vector<16x128xf32> to vector<16x128xbf16>
    %c0_78 = arith.constant 0 : index
    %c0_79 = arith.constant 0 : index
    %185 = vector.load %arg3[%c0_78, %c0_79] : memref<128x512xbf16, #tpu.memory_space<vmem>>, vector<128x512xbf16>
    %cst_80 = arith.constant dense<0.000000e+00> : vector<16x512xf32>
    %186 = tpu.matmul %184, %185, %cst_80 {dimension_numbers = #tpu.dot_dimension_numbers<[1], [0], [0], [1], [0, 0, 1, 1], [], []>} : vector<16x128xbf16>, vector<128x512xbf16>, vector<16x512xf32> -> vector<16x512xf32>
    %187 = arith.addf %183, %186 : vector<16x512xf32>
    %188 = vector.extract_strided_slice %187 {offsets = [0, 0], sizes = [16, 128], strides = [1, 1]} : vector<16x512xf32> to vector<16x128xf32>
    %189 = arith.negf %188 : vector<16x128xf32>
    %190 = math.exp %189 : vector<16x128xf32>
    %cst_81 = arith.constant 1.000000e+00 : f32
    %191 = vector.broadcast %cst_81 : f32 to vector<16x128xf32>
    %192 = arith.addf %191, %190 : vector<16x128xf32>
    %193 = arith.divf %191, %192 : vector<16x128xf32>
    %194 = vector.extract_strided_slice %187 {offsets = [0, 128], sizes = [16, 128], strides = [1, 1]} : vector<16x512xf32> to vector<16x128xf32>
    %195 = arith.negf %194 : vector<16x128xf32>
    %196 = math.exp %195 : vector<16x128xf32>
    %cst_82 = arith.constant 1.000000e+00 : f32
    %197 = vector.broadcast %cst_82 : f32 to vector<16x128xf32>
    %198 = arith.addf %197, %196 : vector<16x128xf32>
    %199 = arith.divf %197, %198 : vector<16x128xf32>
    %200 = vector.extract_strided_slice %187 {offsets = [0, 256], sizes = [16, 128], strides = [1, 1]} : vector<16x512xf32> to vector<16x128xf32>
    %201 = math.tanh %200 : vector<16x128xf32>
    %202 = vector.extract_strided_slice %187 {offsets = [0, 384], sizes = [16, 128], strides = [1, 1]} : vector<16x512xf32> to vector<16x128xf32>
    %203 = arith.negf %202 : vector<16x128xf32>
    %204 = math.exp %203 : vector<16x128xf32>
    %cst_83 = arith.constant 1.000000e+00 : f32
    %205 = vector.broadcast %cst_83 : f32 to vector<16x128xf32>
    %206 = arith.addf %205, %204 : vector<16x128xf32>
    %207 = arith.divf %205, %206 : vector<16x128xf32>
    %c0_84 = arith.constant 0 : index
    %c0_85 = arith.constant 0 : index
    %208 = vector.load %arg7[%c0_84, %c0_85] : memref<16x128xf32, #tpu.memory_space<vmem>>, vector<16x128xf32>
    %209 = arith.mulf %199, %208 : vector<16x128xf32>
    %210 = arith.mulf %193, %201 : vector<16x128xf32>
    %211 = arith.addf %209, %210 : vector<16x128xf32>
    %212 = math.tanh %211 : vector<16x128xf32>
    %213 = arith.mulf %207, %212 : vector<16x128xf32>
    %c0_86 = arith.constant 0 : index
    %c0_87 = arith.constant 0 : index
    %214 = vector.load %arg7[%c0_86, %c0_87] : memref<16x128xf32, #tpu.memory_space<vmem>>, vector<16x128xf32>
    tpu.vector_store %arg7[%c0_86, %c0_87], %211 {strides = array<i32>} : memref<16x128xf32, #tpu.memory_space<vmem>>, vector<16x128xf32>,
    %c0_88 = arith.constant 0 : index
    %c0_89 = arith.constant 0 : index
    %215 = vector.load %arg6[%c0_88, %c0_89] : memref<16x128xf32, #tpu.memory_space<vmem>>, vector<16x128xf32>
    tpu.vector_store %arg6[%c0_88, %c0_89], %213 {strides = array<i32>} : memref<16x128xf32, #tpu.memory_space<vmem>>, vector<16x128xf32>,
    %216 = arith.truncf %213 : vector<16x128xf32> to vector<16x128xbf16>
    %217 = arith.index_cast %c4_i32 : i32 to index
    %c0_90 = arith.constant 0 : index
    %c0_91 = arith.constant 0 : index
    %218 = vector.load %arg5[%217, %c0_90, %c0_91] : memref<8x16x128xbf16, #tpu.memory_space<vmem>>, vector<1x16x128xbf16>
    %219 = vector.shape_cast %218 : vector<1x16x128xbf16> to vector<16x128xbf16>
    %220 = vector.shape_cast %216 : vector<16x128xbf16> to vector<1x16x128xbf16>
    tpu.vector_store %arg5[%217, %c0_90, %c0_91], %220 {strides = array<i32>} : memref<8x16x128xbf16, #tpu.memory_space<vmem>>, vector<1x16x128xbf16>,
    %c5_i32 = arith.constant 5 : i32
    %c0_92 = arith.constant 0 : index
    %c0_93 = arith.constant 0 : index
    %221 = vector.load %arg6[%c0_92, %c0_93] : memref<16x128xf32, #tpu.memory_space<vmem>>, vector<16x128xf32>
    %222 = arith.index_cast %c5_i32 : i32 to index
    %c0_94 = arith.constant 0 : index
    %c0_95 = arith.constant 0 : index
    %223 = vector.load %arg2[%222, %c0_94, %c0_95] : memref<8x16x512xbf16, #tpu.memory_space<vmem>>, vector<1x16x512xbf16>
    %224 = vector.shape_cast %223 : vector<1x16x512xbf16> to vector<16x512xbf16>
    %225 = arith.extf %224 : vector<16x512xbf16> to vector<16x512xf32>
    %226 = arith.addf %225, %5 : vector<16x512xf32>
    %227 = arith.truncf %221 : vector<16x128xf32> to vector<16x128xbf16>
    %c0_96 = arith.constant 0 : index
    %c0_97 = arith.constant 0 : index
    %228 = vector.load %arg3[%c0_96, %c0_97] : memref<128x512xbf16, #tpu.memory_space<vmem>>, vector<128x512xbf16>
    %cst_98 = arith.constant dense<0.000000e+00> : vector<16x512xf32>
    %229 = tpu.matmul %227, %228, %cst_98 {dimension_numbers = #tpu.dot_dimension_numbers<[1], [0], [0], [1], [0, 0, 1, 1], [], []>} : vector<16x128xbf16>, vector<128x512xbf16>, vector<16x512xf32> -> vector<16x512xf32>
    %230 = arith.addf %226, %229 : vector<16x512xf32>
    %231 = vector.extract_strided_slice %230 {offsets = [0, 0], sizes = [16, 128], strides = [1, 1]} : vector<16x512xf32> to vector<16x128xf32>
    %232 = arith.negf %231 : vector<16x128xf32>
    %233 = math.exp %232 : vector<16x128xf32>
    %cst_99 = arith.constant 1.000000e+00 : f32
    %234 = vector.broadcast %cst_99 : f32 to vector<16x128xf32>
    %235 = arith.addf %234, %233 : vector<16x128xf32>
    %236 = arith.divf %234, %235 : vector<16x128xf32>
    %237 = vector.extract_strided_slice %230 {offsets = [0, 128], sizes = [16, 128], strides = [1, 1]} : vector<16x512xf32> to vector<16x128xf32>
    %238 = arith.negf %237 : vector<16x128xf32>
    %239 = math.exp %238 : vector<16x128xf32>
    %cst_100 = arith.constant 1.000000e+00 : f32
    %240 = vector.broadcast %cst_100 : f32 to vector<16x128xf32>
    %241 = arith.addf %240, %239 : vector<16x128xf32>
    %242 = arith.divf %240, %241 : vector<16x128xf32>
    %243 = vector.extract_strided_slice %230 {offsets = [0, 256], sizes = [16, 128], strides = [1, 1]} : vector<16x512xf32> to vector<16x128xf32>
    %244 = math.tanh %243 : vector<16x128xf32>
    %245 = vector.extract_strided_slice %230 {offsets = [0, 384], sizes = [16, 128], strides = [1, 1]} : vector<16x512xf32> to vector<16x128xf32>
    %246 = arith.negf %245 : vector<16x128xf32>
    %247 = math.exp %246 : vector<16x128xf32>
    %cst_101 = arith.constant 1.000000e+00 : f32
    %248 = vector.broadcast %cst_101 : f32 to vector<16x128xf32>
    %249 = arith.addf %248, %247 : vector<16x128xf32>
    %250 = arith.divf %248, %249 : vector<16x128xf32>
    %c0_102 = arith.constant 0 : index
    %c0_103 = arith.constant 0 : index
    %251 = vector.load %arg7[%c0_102, %c0_103] : memref<16x128xf32, #tpu.memory_space<vmem>>, vector<16x128xf32>
    %252 = arith.mulf %242, %251 : vector<16x128xf32>
    %253 = arith.mulf %236, %244 : vector<16x128xf32>
    %254 = arith.addf %252, %253 : vector<16x128xf32>
    %255 = math.tanh %254 : vector<16x128xf32>
    %256 = arith.mulf %250, %255 : vector<16x128xf32>
    %c0_104 = arith.constant 0 : index
    %c0_105 = arith.constant 0 : index
    %257 = vector.load %arg7[%c0_104, %c0_105] : memref<16x128xf32, #tpu.memory_space<vmem>>, vector<16x128xf32>
    tpu.vector_store %arg7[%c0_104, %c0_105], %254 {strides = array<i32>} : memref<16x128xf32, #tpu.memory_space<vmem>>, vector<16x128xf32>,
    %c0_106 = arith.constant 0 : index
    %c0_107 = arith.constant 0 : index
    %258 = vector.load %arg6[%c0_106, %c0_107] : memref<16x128xf32, #tpu.memory_space<vmem>>, vector<16x128xf32>
    tpu.vector_store %arg6[%c0_106, %c0_107], %256 {strides = array<i32>} : memref<16x128xf32, #tpu.memory_space<vmem>>, vector<16x128xf32>,
    %259 = arith.truncf %256 : vector<16x128xf32> to vector<16x128xbf16>
    %260 = arith.index_cast %c5_i32 : i32 to index
    %c0_108 = arith.constant 0 : index
    %c0_109 = arith.constant 0 : index
    %261 = vector.load %arg5[%260, %c0_108, %c0_109] : memref<8x16x128xbf16, #tpu.memory_space<vmem>>, vector<1x16x128xbf16>
    %262 = vector.shape_cast %261 : vector<1x16x128xbf16> to vector<16x128xbf16>
    %263 = vector.shape_cast %259 : vector<16x128xbf16> to vector<1x16x128xbf16>
    tpu.vector_store %arg5[%260, %c0_108, %c0_109], %263 {strides = array<i32>} : memref<8x16x128xbf16, #tpu.memory_space<vmem>>, vector<1x16x128xbf16>,
    %c6_i32 = arith.constant 6 : i32
    %c0_110 = arith.constant 0 : index
    %c0_111 = arith.constant 0 : index
    %264 = vector.load %arg6[%c0_110, %c0_111] : memref<16x128xf32, #tpu.memory_space<vmem>>, vector<16x128xf32>
    %265 = arith.index_cast %c6_i32 : i32 to index
    %c0_112 = arith.constant 0 : index
    %c0_113 = arith.constant 0 : index
    %266 = vector.load %arg2[%265, %c0_112, %c0_113] : memref<8x16x512xbf16, #tpu.memory_space<vmem>>, vector<1x16x512xbf16>
    %267 = vector.shape_cast %266 : vector<1x16x512xbf16> to vector<16x512xbf16>
    %268 = arith.extf %267 : vector<16x512xbf16> to vector<16x512xf32>
    %269 = arith.addf %268, %5 : vector<16x512xf32>
    %270 = arith.truncf %264 : vector<16x128xf32> to vector<16x128xbf16>
    %c0_114 = arith.constant 0 : index
    %c0_115 = arith.constant 0 : index
    %271 = vector.load %arg3[%c0_114, %c0_115] : memref<128x512xbf16, #tpu.memory_space<vmem>>, vector<128x512xbf16>
    %cst_116 = arith.constant dense<0.000000e+00> : vector<16x512xf32>
    %272 = tpu.matmul %270, %271, %cst_116 {dimension_numbers = #tpu.dot_dimension_numbers<[1], [0], [0], [1], [0, 0, 1, 1], [], []>} : vector<16x128xbf16>, vector<128x512xbf16>, vector<16x512xf32> -> vector<16x512xf32>
    %273 = arith.addf %269, %272 : vector<16x512xf32>
    %274 = vector.extract_strided_slice %273 {offsets = [0, 0], sizes = [16, 128], strides = [1, 1]} : vector<16x512xf32> to vector<16x128xf32>
    %275 = arith.negf %274 : vector<16x128xf32>
    %276 = math.exp %275 : vector<16x128xf32>
    %cst_117 = arith.constant 1.000000e+00 : f32
    %277 = vector.broadcast %cst_117 : f32 to vector<16x128xf32>
    %278 = arith.addf %277, %276 : vector<16x128xf32>
    %279 = arith.divf %277, %278 : vector<16x128xf32>
    %280 = vector.extract_strided_slice %273 {offsets = [0, 128], sizes = [16, 128], strides = [1, 1]} : vector<16x512xf32> to vector<16x128xf32>
    %281 = arith.negf %280 : vector<16x128xf32>
    %282 = math.exp %281 : vector<16x128xf32>
    %cst_118 = arith.constant 1.000000e+00 : f32
    %283 = vector.broadcast %cst_118 : f32 to vector<16x128xf32>
    %284 = arith.addf %283, %282 : vector<16x128xf32>
    %285 = arith.divf %283, %284 : vector<16x128xf32>
    %286 = vector.extract_strided_slice %273 {offsets = [0, 256], sizes = [16, 128], strides = [1, 1]} : vector<16x512xf32> to vector<16x128xf32>
    %287 = math.tanh %286 : vector<16x128xf32>
    %288 = vector.extract_strided_slice %273 {offsets = [0, 384], sizes = [16, 128], strides = [1, 1]} : vector<16x512xf32> to vector<16x128xf32>
    %289 = arith.negf %288 : vector<16x128xf32>
    %290 = math.exp %289 : vector<16x128xf32>
    %cst_119 = arith.constant 1.000000e+00 : f32
    %291 = vector.broadcast %cst_119 : f32 to vector<16x128xf32>
    %292 = arith.addf %291, %290 : vector<16x128xf32>
    %293 = arith.divf %291, %292 : vector<16x128xf32>
    %c0_120 = arith.constant 0 : index
    %c0_121 = arith.constant 0 : index
    %294 = vector.load %arg7[%c0_120, %c0_121] : memref<16x128xf32, #tpu.memory_space<vmem>>, vector<16x128xf32>
    %295 = arith.mulf %285, %294 : vector<16x128xf32>
    %296 = arith.mulf %279, %287 : vector<16x128xf32>
    %297 = arith.addf %295, %296 : vector<16x128xf32>
    %298 = math.tanh %297 : vector<16x128xf32>
    %299 = arith.mulf %293, %298 : vector<16x128xf32>
    %c0_122 = arith.constant 0 : index
    %c0_123 = arith.constant 0 : index
    %300 = vector.load %arg7[%c0_122, %c0_123] : memref<16x128xf32, #tpu.memory_space<vmem>>, vector<16x128xf32>
    tpu.vector_store %arg7[%c0_122, %c0_123], %297 {strides = array<i32>} : memref<16x128xf32, #tpu.memory_space<vmem>>, vector<16x128xf32>,
    %c0_124 = arith.constant 0 : index
    %c0_125 = arith.constant 0 : index
    %301 = vector.load %arg6[%c0_124, %c0_125] : memref<16x128xf32, #tpu.memory_space<vmem>>, vector<16x128xf32>
    tpu.vector_store %arg6[%c0_124, %c0_125], %299 {strides = array<i32>} : memref<16x128xf32, #tpu.memory_space<vmem>>, vector<16x128xf32>,
    %302 = arith.truncf %299 : vector<16x128xf32> to vector<16x128xbf16>
    %303 = arith.index_cast %c6_i32 : i32 to index
    %c0_126 = arith.constant 0 : index
    %c0_127 = arith.constant 0 : index
    %304 = vector.load %arg5[%303, %c0_126, %c0_127] : memref<8x16x128xbf16, #tpu.memory_space<vmem>>, vector<1x16x128xbf16>
    %305 = vector.shape_cast %304 : vector<1x16x128xbf16> to vector<16x128xbf16>
    %306 = vector.shape_cast %302 : vector<16x128xbf16> to vector<1x16x128xbf16>
    tpu.vector_store %arg5[%303, %c0_126, %c0_127], %306 {strides = array<i32>} : memref<8x16x128xbf16, #tpu.memory_space<vmem>>, vector<1x16x128xbf16>,
    %c7_i32 = arith.constant 7 : i32
    %c0_128 = arith.constant 0 : index
    %c0_129 = arith.constant 0 : index
    %307 = vector.load %arg6[%c0_128, %c0_129] : memref<16x128xf32, #tpu.memory_space<vmem>>, vector<16x128xf32>
    %308 = arith.index_cast %c7_i32 : i32 to index
    %c0_130 = arith.constant 0 : index
    %c0_131 = arith.constant 0 : index
    %309 = vector.load %arg2[%308, %c0_130, %c0_131] : memref<8x16x512xbf16, #tpu.memory_space<vmem>>, vector<1x16x512xbf16>
    %310 = vector.shape_cast %309 : vector<1x16x512xbf16> to vector<16x512xbf16>
    %311 = arith.extf %310 : vector<16x512xbf16> to vector<16x512xf32>
    %312 = arith.addf %311, %5 : vector<16x512xf32>
    %313 = arith.truncf %307 : vector<16x128xf32> to vector<16x128xbf16>
    %c0_132 = arith.constant 0 : index
    %c0_133 = arith.constant 0 : index
    %314 = vector.load %arg3[%c0_132, %c0_133] : memref<128x512xbf16, #tpu.memory_space<vmem>>, vector<128x512xbf16>
    %cst_134 = arith.constant dense<0.000000e+00> : vector<16x512xf32>
    %315 = tpu.matmul %313, %314, %cst_134 {dimension_numbers = #tpu.dot_dimension_numbers<[1], [0], [0], [1], [0, 0, 1, 1], [], []>} : vector<16x128xbf16>, vector<128x512xbf16>, vector<16x512xf32> -> vector<16x512xf32>
    %316 = arith.addf %312, %315 : vector<16x512xf32>
    %317 = vector.extract_strided_slice %316 {offsets = [0, 0], sizes = [16, 128], strides = [1, 1]} : vector<16x512xf32> to vector<16x128xf32>
    %318 = arith.negf %317 : vector<16x128xf32>
    %319 = math.exp %318 : vector<16x128xf32>
    %cst_135 = arith.constant 1.000000e+00 : f32
    %320 = vector.broadcast %cst_135 : f32 to vector<16x128xf32>
    %321 = arith.addf %320, %319 : vector<16x128xf32>
    %322 = arith.divf %320, %321 : vector<16x128xf32>
    %323 = vector.extract_strided_slice %316 {offsets = [0, 128], sizes = [16, 128], strides = [1, 1]} : vector<16x512xf32> to vector<16x128xf32>
    %324 = arith.negf %323 : vector<16x128xf32>
    %325 = math.exp %324 : vector<16x128xf32>
    %cst_136 = arith.constant 1.000000e+00 : f32
    %326 = vector.broadcast %cst_136 : f32 to vector<16x128xf32>
    %327 = arith.addf %326, %325 : vector<16x128xf32>
    %328 = arith.divf %326, %327 : vector<16x128xf32>
    %329 = vector.extract_strided_slice %316 {offsets = [0, 256], sizes = [16, 128], strides = [1, 1]} : vector<16x512xf32> to vector<16x128xf32>
    %330 = math.tanh %329 : vector<16x128xf32>
    %331 = vector.extract_strided_slice %316 {offsets = [0, 384], sizes = [16, 128], strides = [1, 1]} : vector<16x512xf32> to vector<16x128xf32>
    %332 = arith.negf %331 : vector<16x128xf32>
    %333 = math.exp %332 : vector<16x128xf32>
    %cst_137 = arith.constant 1.000000e+00 : f32
    %334 = vector.broadcast %cst_137 : f32 to vector<16x128xf32>
    %335 = arith.addf %334, %333 : vector<16x128xf32>
    %336 = arith.divf %334, %335 : vector<16x128xf32>
    %c0_138 = arith.constant 0 : index
    %c0_139 = arith.constant 0 : index
    %337 = vector.load %arg7[%c0_138, %c0_139] : memref<16x128xf32, #tpu.memory_space<vmem>>, vector<16x128xf32>
    %338 = arith.mulf %328, %337 : vector<16x128xf32>
    %339 = arith.mulf %322, %330 : vector<16x128xf32>
    %340 = arith.addf %338, %339 : vector<16x128xf32>
    %341 = math.tanh %340 : vector<16x128xf32>
    %342 = arith.mulf %336, %341 : vector<16x128xf32>
    %c0_140 = arith.constant 0 : index
    %c0_141 = arith.constant 0 : index
    %343 = vector.load %arg7[%c0_140, %c0_141] : memref<16x128xf32, #tpu.memory_space<vmem>>, vector<16x128xf32>
    tpu.vector_store %arg7[%c0_140, %c0_141], %340 {strides = array<i32>} : memref<16x128xf32, #tpu.memory_space<vmem>>, vector<16x128xf32>,
    %c0_142 = arith.constant 0 : index
    %c0_143 = arith.constant 0 : index
    %344 = vector.load %arg6[%c0_142, %c0_143] : memref<16x128xf32, #tpu.memory_space<vmem>>, vector<16x128xf32>
    tpu.vector_store %arg6[%c0_142, %c0_143], %342 {strides = array<i32>} : memref<16x128xf32, #tpu.memory_space<vmem>>, vector<16x128xf32>,
    %345 = arith.truncf %342 : vector<16x128xf32> to vector<16x128xbf16>
    %346 = arith.index_cast %c7_i32 : i32 to index
    %c0_144 = arith.constant 0 : index
    %c0_145 = arith.constant 0 : index
    %347 = vector.load %arg5[%346, %c0_144, %c0_145] : memref<8x16x128xbf16, #tpu.memory_space<vmem>>, vector<1x16x128xbf16>
    %348 = vector.shape_cast %347 : vector<1x16x128xbf16> to vector<16x128xbf16>
    %349 = vector.shape_cast %345 : vector<16x128xbf16> to vector<1x16x128xbf16>
    tpu.vector_store %arg5[%346, %c0_144, %c0_145], %349 {strides = array<i32>} : memref<8x16x128xbf16, #tpu.memory_space<vmem>>, vector<1x16x128xbf16>,
    %c8_i32 = arith.constant 8 : i32
    return
  }
  func.func @transform_0(%arg0: i32, %arg1: i32) -> (i32, i32, i32) {
    %c0_i32 = arith.constant 0 : i32
    %c0_i32_0 = arith.constant 0 : i32
    return %arg1, %arg0, %c0_i32 : i32, i32, i32
  }
  func.func @transform_1(%arg0: i32, %arg1: i32) -> (i32, i32) {
    %c0_i32 = arith.constant 0 : i32
    %c0_i32_0 = arith.constant 0 : i32
    %c0_i32_1 = arith.constant 0 : i32
    return %c0_i32, %c0_i32_0 : i32, i32
  }
  func.func @transform_2(%arg0: i32, %arg1: i32) -> (i32, i32) {
    %c0_i32 = arith.constant 0 : i32
    %c0_i32_0 = arith.constant 0 : i32
    %c0_i32_1 = arith.constant 0 : i32
    return %c0_i32, %c0_i32_0 : i32, i32
  }
  func.func @transform_3(%arg0: i32, %arg1: i32) -> (i32, i32, i32) {
    %c0_i32 = arith.constant 0 : i32
    %c0_i32_0 = arith.constant 0 : i32
    return %arg1, %arg0, %c0_i32 : i32, i32, i32
  }
}

</mosaic_0001>

<bundles_post_ra>
// kernel: tpu_custom_call.1
= control target key start
LH: loop header
LB: loop body
LE: loop exit
PB: predicated region body
PF: predicated region fallthrough
CT: control target
= control target key end

     0   :  { %8 = vsyncpa [#allocation5], 0  ;;  %s4607_s0 = inlined_call_operand.hbm [shape: bf16[8,16,512], index: 0, kind: input, shape index: {}]   ;;  %s4608_s1 = inlined_call_operand.hbm [shape: bf16[128,512], index: 1, kind: input, shape index: {}]   ;;  %s4609_s2 = inlined_call_operand.vmem [shape: f32[1,512], index: 2, kind: input, shape index: {}]   ;;  %s4610_s3 = inlined_call_operand.hbm [shape: bf16[8,16,128], index: 3, kind: output, shape index: {}]  }
   0x1   :  { %9 = vsyncpa [#allocation8], 0 }
   0x2   :  { %10 = vsyncpa [#allocation6], 0  ;;  %s3947_s12 = smov [#allocation4]   ;;  %s3875_s16 = scalar_lea.hbm %s4607_s0, 4096 }
   0x3   :  { %s16_s13 = sshll.u32 %s3947_s12, 4  ;;  %p3876_p0 = scmp.ne.s32.totalorder %s4607_s0, %s3875_s16  ;;  %s17_s13 = int_to_ptr.vmem [resolvable:$true] %s16_s13 }
   0x4   :  { %p3879_p1 = scmp.lt.u32.totalorder %s3875_s16, %s4607_s0 }
   0x6   :  { %p3881_p2 = pnand %p3879_p1, %p3876_p0 }
   0x8   :  { %3884 = shalt.err (!%p3881_p2)
}
   0x9   :  { %s3885_s21 = scalar_lea.vmem %s17_s13, 4096  ;;  %p3890_p4 = scmp.lt.s32.totalorder %s17_s13, %s17_s13 }
   0xa   :  { %p3886_p3 = scmp.ne.s32.totalorder %s17_s13, %s3885_s21  ;;  %p3891_p5 = scmp.lt.s32.totalorder %s3885_s21, %s3885_s21 }
   0xc   :  { %p3892_p6 = por %p3891_p5, %p3890_p4 }
   0xe   :  { %p3893_p7 = pnand %p3892_p6, %p3886_p3 }
  0x10   :  { %3896 = shalt.err (!%p3893_p7)
}
  0x11   :  { %s3948_s22 = smov 256   ;;  %s3949_s23 = smov 16  }
  0x12   :  { %22 = dma.hbm_to_vmem [thread:$0]  %s4607_s0, 4096, %s17_s13, [#allocation5], %s3948_s22, %s3948_s22, %s3949_s23  }
  0x13   :  { %s3950_s26 = smov [#allocation7]   ;;  %s3897_s30 = scalar_lea.hbm %s4608_s1, 4096 }
  0x14   :  { %s28_s27 = sshll.u32 %s3950_s26, 4  ;;  %p3898_p8 = scmp.ne.s32.totalorder %s4608_s1, %s3897_s30  ;;  %s29_s27 = int_to_ptr.vmem [resolvable:$true] %s28_s27 }
  0x15   :  { %p3901_p9 = scmp.lt.u32.totalorder %s3897_s30, %s4608_s1 }
  0x17   :  { %p3903_p10 = pnand %p3901_p9, %p3898_p8 }
  0x19   :  { %3906 = shalt.err (!%p3903_p10)
}
  0x1a   :  { %s3907_s8 = scalar_lea.vmem %s29_s27, 4096  ;;  %p3912_p12 = scmp.lt.s32.totalorder %s29_s27, %s29_s27 }
  0x1b   :  { %p3908_p11 = scmp.ne.s32.totalorder %s29_s27, %s3907_s8  ;;  %p3913_p13 = scmp.lt.s32.totalorder %s3907_s8, %s3907_s8 }
  0x1d   :  { %p3914_p0 = por %p3913_p13, %p3912_p12 }
  0x1f   :  { %p3915_p1 = pnand %p3914_p0, %p3908_p11 }
  0x21   :  { %3918 = shalt.err (!%p3915_p1)
}
  0x22   :  { %34 = dma.hbm_to_vmem [thread:$0]  %s4608_s1, 4096, %s29_s27, [#allocation8], %s3948_s22, %s3948_s22, %s3949_s23  }
  0x23   :  { %3941 = dma.done.wait [#allocation5], 4096  }
  0x24   :  { %3942 = vsyncadd [#allocation5], 4294963200 }
  0x25   :  { %3943 = dma.done.wait [#allocation8], 4096  }
  0x26   :  { %3944 = vsyncadd [#allocation8], 4294963200  ;;  %v4611_v0 = vmov 0   ;;  %v4002_v1 = vld [vmem:[#allocation7 + $0x4] ss:$16 sps:$4 sm:$0xff]   ;;  %v3952_v33 = vmov 0.0|0.0   ;;  %v54_v34 = vlaneseq }
  0x27   :  { %321 = vmatprep.mubr.bf16.mxu0 %v4611_v0  ;;  %364 = vmatprep.mubr.bf16.mxu1 %v4611_v0  ;;  %v4004_v2 = vld [vmem:[#allocation7] ss:$16 sps:$4 sm:$0xff]   ;;  %v4007_v3 = vld [vmem:[#allocation7 + $0x24] ss:$16 sps:$4 sm:$0xff]   ;;  %v4015_v6 = vld [vmem:[#allocation7 + $0xc] ss:$16 sps:$4 sm:$0xff]  }
  0x28   :  { %289 = vmatprep.subr.bf16.mxu0 %v4002_v1  ;;  %v4010_v4 = vld [vmem:[#allocation7 + $0x20] ss:$16 sps:$4 sm:$0xff]   ;;  %v4013_v5 = vld [vmem:[#allocation7 + $0x44] ss:$16 sps:$4 sm:$0xff]   ;;  %v4017_v7 = vld [vmem:[#allocation7 + $0x8] ss:$16 sps:$4 sm:$0xff]   ;;  %332 = vmatprep.subr.bf16.mxu1 %v4015_v6 }
  0x29   :  { %290 = vmatpush1.bf16.msra.mxu0 %v4004_v2  ;;  %v4020_v8 = vld [vmem:[#allocation7 + $0x40] ss:$16 sps:$4 sm:$0xff]   ;;  %v4024_v9 = vld [vmem:[#allocation7 + $0x64] ss:$16 sps:$4 sm:$0xff]   ;;  %333 = vmatpush1.bf16.msra.mxu1 %v4017_v7  ;;  %v4027_v10 = vld [vmem:[#allocation7 + $0x2c] ss:$16 sps:$4 sm:$0xff]  }
  0x2a   :  { %291 = vmatprep.subr.bf16.mxu0 %v4007_v3  ;;  %v4029_v11 = vld [vmem:[#allocation7 + $0x28] ss:$16 sps:$4 sm:$0xff]   ;;  %334 = vmatprep.subr.bf16.mxu1 %v4027_v10  ;;  %v4033_v12 = vld [vmem:[#allocation7 + $0x60] ss:$16 sps:$4 sm:$0xff]   ;;  %v4035_v13 = vld [vmem:[#allocation7 + $0x84] ss:$16 sps:$4 sm:$0xff]  }
  0x2b   :  { %v4037_v14 = vld [vmem:[#allocation7 + $0x4c] ss:$16 sps:$4 sm:$0xff]   ;;  %v4041_v15 = vld [vmem:[#allocation7 + $0x48] ss:$16 sps:$4 sm:$0xff]   ;;  %v4047_v17 = vld [vmem:[#allocation7 + $0x80] ss:$16 sps:$4 sm:$0xff]  }
  0x2c   :  { %v4044_v16 = vld [vmem:[#allocation7 + $0x6c] ss:$16 sps:$4 sm:$0xff]   ;;  %v4050_v18 = vld [vmem:[#allocation7 + $0xa4] ss:$16 sps:$4 sm:$0xff]   ;;  %v4053_v19 = vld [vmem:[#allocation7 + $0x68] ss:$16 sps:$4 sm:$0xff]  }
  0x2d   :  { %292 = vmatpush1.bf16.msra.mxu0 %v4010_v4  ;;  %335 = vmatpush1.bf16.msra.mxu1 %v4029_v11  ;;  %v4056_v20 = vld [vmem:[#allocation7 + $0x8c] ss:$16 sps:$4 sm:$0xff]   ;;  %v4059_v21 = vld [vmem:[#allocation7 + $0xa0] ss:$16 sps:$4 sm:$0xff]   ;;  %v4061_v22 = vld [vmem:[#allocation7 + $0xc4] ss:$16 sps:$4 sm:$0xff]  }
  0x2e   :  { %293 = vmatprep.subr.bf16.mxu0 %v4013_v5  ;;  %336 = vmatprep.subr.bf16.mxu1 %v4037_v14  ;;  %v4065_v23 = vld [vmem:[#allocation7 + $0x88] ss:$16 sps:$4 sm:$0xff]   ;;  %v4067_v24 = vld [vmem:[#allocation7 + $0xc0] ss:$16 sps:$4 sm:$0xff]   ;;  %v4070_v25 = vld [vmem:[#allocation7 + $0xac] ss:$16 sps:$4 sm:$0xff]  }
  0x2f   :  { %v4072_v26 = vld [vmem:[#allocation7 + $0xe4] ss:$16 sps:$4 sm:$0xff]   ;;  %v4074_v27 = vld [vmem:[#allocation7 + $0xa8] ss:$16 sps:$4 sm:$0xff]   ;;  %v4077_v28 = vld [vmem:[#allocation7 + $0xcc] ss:$16 sps:$4 sm:$0xff]  }
  0x30   :  { %v4081_v29 = vld [vmem:[#allocation7 + $0xe0] ss:$16 sps:$4 sm:$0xff]   ;;  %v4084_v30 = vld [vmem:[#allocation7 + $0xc8] ss:$16 sps:$4 sm:$0xff]   ;;  %v4087_v31 = vld [vmem:[#allocation7 + $0xec] ss:$16 sps:$4 sm:$0xff]  }
  0x31   :  { %294 = vmatpush1.bf16.msra.mxu0 %v4020_v8  ;;  %337 = vmatpush1.bf16.msra.mxu1 %v4041_v15  ;;  %v4092_v32 = vld [vmem:[#allocation7 + $0xe8] ss:$16 sps:$4 sm:$0xff]   ;;  %v55_v35 = vshrl.u32 %v54_v34, 7  ;;  %v52_v37 = vld [vmem:[%s4609_s2] sm:$0xf]  ;;  %v78_v40 = vld [vmem:[#allocation4 + $0x10] sm:$0xff] }
  0x32   :  { %295 = vmatprep.subr.bf16.mxu0 %v4024_v9  ;;  %338 = vmatprep.subr.bf16.mxu1 %v4044_v16  ;;  %v76_v38 = vld [vmem:[#allocation4] sm:$0xff]  ;;  %v84_v45 = vunpack.c.l.bf16 %v78_v40  ;;  %v85_v46 = vunpack.c.h.bf16 %v78_v40  ;;  %v77_v49 = vld [vmem:[#allocation4 + $0x8] sm:$0xff]  ;;  %v79_v52 = vld [vmem:[#allocation4 + $0x18] sm:$0xff]  ;;  %s3953_s2 = smov [#allocation9]  }
  0x33   :  { %v56_v36 = vsub.s32 0, %v55_v35  ;;  %v60_v39 = vsub.s32 1, %v55_v35  ;;  %v80_v42 = vunpack.c.l.bf16 %v76_v38  ;;  %v81_v44 = vunpack.c.h.bf16 %v76_v38  ;;  %s3077_s11 = sshll.u32 %s3953_s2, 4  ;;  %s3078_s11 = int_to_ptr.vmem [resolvable:$true] %s3077_s11 }
  0x34   :  { %v68_v47 = vsub.s32 3, %v55_v35  ;;  %v64_v51 = vsub.s32 2, %v55_v35  ;;  %v83_v57 = vunpack.c.h.bf16 %v77_v49  ;;  %v87_v60 = vunpack.c.h.bf16 %v79_v52  ;;  %s3919_s12 = scalar_lea.vmem %s3078_s11, 1024  ;;  %p3924_p3 = scmp.lt.s32.totalorder %s3078_s11, %s3078_s11 }
  0x35   :  { %296 = vmatpush1.bf16.msra.mxu0 %v4033_v12  ;;  %339 = vmatpush1.bf16.msra.mxu1 %v4053_v19  ;;  %v4137_v41 = vrot.slane %v52_v37, %v56_v36  ;;  %v4139_v43 = vrot.slane %v52_v37, %v60_v39  ;;  %v86_v35 = vunpack.c.l.bf16 %v79_v52  ;;  %p3920_p2 = scmp.ne.s32.totalorder %s3078_s11, %s3919_s12  ;;  %p3925_p4 = scmp.lt.s32.totalorder %s3919_s12, %s3919_s12 }
  0x36   :  { %297 = vmatprep.subr.bf16.mxu0 %v4035_v13  ;;  %340 = vmatprep.subr.bf16.mxu1 %v4056_v20  ;;  %v4145_v56 = vrot.slane %v52_v37, %v68_v47  ;;  %v4147_v63 = vrot.slane %v52_v37, %v64_v51 }
  0x37   :  { %v88_v48 = vadd.f32 %v80_v42, %v4137_v41  ;;  %v89_v50 = vadd.f32 %v81_v44, %v4139_v43  ;;  %v92_v53 = vadd.f32 %v84_v45, %v4137_v41  ;;  %v93_v55 = vadd.f32 %v85_v46, %v4139_v43  ;;  %p3926_p5 = por %p3925_p4, %p3924_p3 }
  0x38   :  { %v91_v39 = vadd.f32 %v83_v57, %v4145_v56  ;;  %v95_v44 = vadd.f32 %v87_v60, %v4145_v56  ;;  %v94_v47 = vadd.f32 %v86_v35, %v4147_v63 }
  0x39   :  { %298 = vmatpush1.bf16.msra.mxu0 %v4047_v17  ;;  %341 = vmatpush1.bf16.msra.mxu1 %v4065_v23  ;;  %p3927_p6 = pnand %p3926_p5, %p3920_p2 }
  0x3a   :  { %299 = vmatprep.subr.bf16.mxu0 %v4050_v18  ;;  %342 = vmatprep.subr.bf16.mxu1 %v4070_v25 }
  0x3d   :  { %300 = vmatpush1.bf16.msra.mxu0 %v4059_v21  ;;  %343 = vmatpush1.bf16.msra.mxu1 %v4074_v27 }
  0x3e   :  { %301 = vmatprep.subr.bf16.mxu0 %v4061_v22  ;;  %344 = vmatprep.subr.bf16.mxu1 %v4077_v28 }
  0x41   :  { %302 = vmatpush1.bf16.msra.mxu0 %v4067_v24  ;;  %345 = vmatpush1.bf16.msra.mxu1 %v4084_v30 }
  0x42   :  { %303 = vmatprep.subr.bf16.mxu0 %v4072_v26  ;;  %346 = vmatprep.subr.bf16.mxu1 %v4087_v31 }
  0x45   :  { %304 = vmatpush1.bf16.msra.mxu0 %v4081_v29  ;;  %347 = vmatpush1.bf16.msra.mxu1 %v4092_v32 }
  0x46   :  { %663 = vmatprep.subr.bf16.mxu0 %v4002_v1  ;;  %706 = vmatprep.subr.bf16.mxu1 %v4015_v6 }
  0x48   :  { %322 = vmatmul.mubr.bf16.vlgmr.msra.gmra.mrb[0].mxu0 %v3952_v33  ;;  %365 = vmatmul.mubr.bf16.vlgmr.msra.gmra.mrb[0].mxu1 %v3952_v33 }
  0x49   :  { %664 = vmatpush1.bf16.msra.mxu0 %v4004_v2  ;;  %695 = vmatprep.mubr.bf16.mxu0 %v4611_v0 }
  0x4a   :  { %665 = vmatprep.subr.bf16.mxu0 %v4007_v3  ;;  %707 = vmatpush1.bf16.msra.mxu1 %v4017_v7 }
  0x4b   :  { %708 = vmatprep.subr.bf16.mxu1 %v4027_v10  ;;  %738 = vmatprep.mubr.bf16.mxu1 %v4611_v0 }
  0x4d   :  { %666 = vmatpush1.bf16.msra.mxu0 %v4010_v4 }
  0x4e   :  { %667 = vmatprep.subr.bf16.mxu0 %v4013_v5  ;;  %709 = vmatpush1.bf16.msra.mxu1 %v4029_v11 }
  0x4f   :  { %710 = vmatprep.subr.bf16.mxu1 %v4037_v14 }
  0x51   :  { %668 = vmatpush1.bf16.msra.mxu0 %v4020_v8 }
  0x52   :  { %669 = vmatprep.subr.bf16.mxu0 %v4024_v9  ;;  %711 = vmatpush1.bf16.msra.mxu1 %v4041_v15 }
  0x53   :  { %712 = vmatprep.subr.bf16.mxu1 %v4044_v16 }
  0x55   :  { %670 = vmatpush1.bf16.msra.mxu0 %v4033_v12 }
  0x56   :  { %671 = vmatprep.subr.bf16.mxu0 %v4035_v13  ;;  %713 = vmatpush1.bf16.msra.mxu1 %v4053_v19 }
  0x57   :  { %714 = vmatprep.subr.bf16.mxu1 %v4056_v20 }
  0x59   :  { %672 = vmatpush1.bf16.msra.mxu0 %v4047_v17 }
  0x5a   :  { %673 = vmatprep.subr.bf16.mxu0 %v4050_v18  ;;  %715 = vmatpush1.bf16.msra.mxu1 %v4065_v23 }
  0x5b   :  { %716 = vmatprep.subr.bf16.mxu1 %v4070_v25 }
  0x5d   :  { %674 = vmatpush1.bf16.msra.mxu0 %v4059_v21 }
  0x5e   :  { %675 = vmatprep.subr.bf16.mxu0 %v4061_v22  ;;  %717 = vmatpush1.bf16.msra.mxu1 %v4074_v27 }
  0x5f   :  { %718 = vmatprep.subr.bf16.mxu1 %v4077_v28 }
  0x61   :  { %676 = vmatpush1.bf16.msra.mxu0 %v4067_v24 }
  0x62   :  { %677 = vmatprep.subr.bf16.mxu0 %v4072_v26  ;;  %719 = vmatpush1.bf16.msra.mxu1 %v4084_v30 }
  0x63   :  { %720 = vmatprep.subr.bf16.mxu1 %v4087_v31 }
  0x65   :  { %678 = vmatpush1.bf16.msra.mxu0 %v4081_v29 }
  0x66   :  { %1038 = vmatprep.subr.bf16.mxu0 %v4002_v1  ;;  %721 = vmatpush1.bf16.msra.mxu1 %v4092_v32  ;;  %v82_v1 = vunpack.c.l.bf16 %v77_v49 }
  0x67   :  { %1081 = vmatprep.subr.bf16.mxu1 %v4015_v6 }
  0x68   :  { %v90_v46 = vadd.f32 %v82_v1, %v4147_v63 }
 0x11b   :  { %v323_v54 = vpop.f32.mrb[0].mxu0  ;;  %v366_v42 = vpop.f32.mrb[0].mxu1 }
 0x11c   :  { %v375_v58 = vadd.f32 %v323_v54, %v88_v48  ;;  %v325_v59 = vpop.f32.mrb[1].mxu0  ;;  %v368_v37 = vpop.f32.mrb[1].mxu1  ;;  %v377_v52 = vadd.f32 %v366_v42, %v90_v46 }
 0x11d   :  { %v376_v61 = vadd.f32 %v325_v59, %v89_v50  ;;  %v327_v62 = vpop.f32.mrb[2].mxu0  ;;  %v370_v48 = vpop.f32.mrb[2].mxu1  ;;  %v378_v49 = vadd.f32 %v368_v37, %v91_v39 }
 0x11e   :  { %v3122_v6 = vmul.f32 -1.442695, %v375_v58  ;;  %v379_v33 = vadd.f32 %v327_v62, %v92_v53  ;;  %v329_v34 = vpop.f32.mrb[3].mxu0  ;;  %v372_v50 = vpop.f32.mrb[3].mxu1  ;;  %v381_v53 = vadd.f32 %v370_v48, %v94_v47 }
 0x11f   :  { %v3124_v36 = vmul.f32 -1.442695, %v376_v61  ;;  %v380_v38 = vadd.f32 %v329_v34, %v93_v55  ;;  %v382_v51 = vadd.f32 %v372_v50, %v95_v44  ;;  %v3126_v54 = vmul.f32 -1.442695, %v378_v49 }
 0x120   :  { %3619 = vpow2.f32 %v3122_v6  ;;  %v3123_v40 = vmul.f32 -1.442695, %v379_v33 }
 0x121   :  { %3621 = vpow2.f32 %v3124_v36  ;;  %v3125_v45 = vmul.f32 -1.442695, %v380_v38  ;;  %v3127_v55 = vmul.f32 -1.442695, %v382_v51 }
 0x122   :  { %3623 = vpow2.f32 %v3123_v40 }
 0x123   :  { %3625 = vpow2.f32 %v3125_v45 }
 0x124   :  { %3627 = vtanh.f32 %v377_v52 }
 0x125   :  { %3629 = vtanh.f32 %v381_v53 }
 0x126   :  { %3631 = vpow2.f32 %v3126_v54 }
 0x127   :  { %3633 = vpow2.f32 %v3127_v55 }
 0x12a   :  { %v3620_v57 = vpop.eup %3619 }
 0x12b   :  { %v3622_v58 = vpop.eup %3621  ;;  %v389_v59 = vadd.f32 1.0, %v3620_v57 }
 0x12c   :  { %v3624_v60 = vpop.eup %3623  ;;  %v401_v61 = vadd.f32 1.0, %v3622_v58 }
 0x12d   :  { %v3626_v62 = vpop.eup %3625  ;;  %3635 = vrcp.f32 %v389_v59  ;;  %v390_v1 = vadd.f32 1.0, %v3624_v60 }
 0x12e   :  { %3637 = vrcp.f32 %v401_v61  ;;  %v402_v6 = vadd.f32 1.0, %v3626_v62  ;;  %v3628_v33 = vpop.eup %3627 }
 0x12f   :  { %3639 = vrcp.f32 %v390_v1  ;;  %v3630_v34 = vpop.eup %3629 }
 0x130   :  { %3641 = vrcp.f32 %v402_v6  ;;  %v3632_v35 = vpop.eup %3631 }
 0x131   :  { %v3634_v36 = vpop.eup %3633  ;;  %v415_v42 = vadd.f32 1.0, %v3632_v35 }
 0x132   :  { %v416_v47 = vadd.f32 1.0, %v3634_v36 }
 0x133   :  { %3643 = vrcp.f32 %v415_v42 }
 0x137   :  { %v3636_v38 = vpop.eup %3635 }
 0x138   :  { %v3638_v39 = vpop.eup %3637  ;;  %v425_v40 = vmul.f32 %v3636_v38, %v3628_v33 }
 0x139   :  { %v3640_v44 = vpop.eup %3639  ;;  %v423_v45 = vmul.f32 0.0, %v3638_v39 }
 0x13a   :  { %v3642_v46 = vpop.eup %3641  ;;  %v426_v37 = vmul.f32 %v3640_v44, %v3630_v34 }
 0x13b   :  { %v424_v48 = vmul.f32 0.0, %v3642_v46  ;;  %v4153_v49 = vadd.f32 %v425_v40, %v423_v45 }
 0x13d   :  { %3645 = vtanh.f32 %v4153_v49  ;;  %v4156_v50 = vadd.f32 %v426_v37, %v424_v48  ;;  %v3644_v51 = vpop.eup %3643 }
 0x13e   :  { %3647 = vrcp.f32 %v416_v47 }
 0x13f   :  { %3649 = vtanh.f32 %v4156_v50 }
 0x147   :  { %v3646_v52 = vpop.eup %3645 }
 0x148   :  { %v3648_v53 = vpop.eup %3647  ;;  %v431_v55 = vmul.f32 %v3646_v52, %v3644_v51 }
 0x149   :  { %v3650_v54 = vpop.eup %3649 }
 0x14a   :  { %v432_v57 = vmul.f32 %v3650_v54, %v3648_v53 }
 0x14c   :  { %v3429_v58 = vpack.c.bf16 %v432_v57, %v431_v55 }
 0x14e   :  { %3430 = vst [vmem:[#allocation9] sm:$0xff] %v3429_v58   ;;  %696 = vmatmul.mubr.bf16.vlgmr.msra.gmra.mrb[4].mxu0 %v3429_v58  ;;  %739 = vmatmul.mubr.bf16.vlgmr.msra.gmra.mrb[4].mxu1 %v3429_v58 }
 0x14f   :  { %1039 = vmatpush1.bf16.msra.mxu0 %v4004_v2  ;;  %1082 = vmatpush1.bf16.msra.mxu1 %v4017_v7  ;;  %v450_v2 = vld [vmem:[#allocation4 + $0x20] sm:$0xff] }
 0x150   :  { %1040 = vmatprep.subr.bf16.mxu0 %v4007_v3  ;;  %1083 = vmatprep.subr.bf16.mxu1 %v4027_v10  ;;  %v452_v3 = vld [vmem:[#allocation4 + $0x30] sm:$0xff]  ;;  %v451_v10 = vld [vmem:[#allocation4 + $0x28] sm:$0xff] }
 0x151   :  { %1070 = vmatprep.mubr.bf16.mxu0 %v4611_v0  ;;  %1113 = vmatprep.mubr.bf16.mxu1 %v4611_v0  ;;  %v458_v7 = vunpack.c.l.bf16 %v452_v3 }
 0x153   :  { %1041 = vmatpush1.bf16.msra.mxu0 %v4010_v4  ;;  %1084 = vmatpush1.bf16.msra.mxu1 %v4029_v11  ;;  %v454_v4 = vunpack.c.l.bf16 %v450_v2 }
 0x154   :  { %1042 = vmatprep.subr.bf16.mxu0 %v4013_v5  ;;  %1085 = vmatprep.subr.bf16.mxu1 %v4037_v14  ;;  %v455_v5 = vunpack.c.h.bf16 %v450_v2 }
 0x156   :  { %v463_v11 = vadd.f32 %v455_v5, %v4139_v43 }
 0x157   :  { %1043 = vmatpush1.bf16.msra.mxu0 %v4020_v8  ;;  %1086 = vmatpush1.bf16.msra.mxu1 %v4041_v15  ;;  %v459_v8 = vunpack.c.h.bf16 %v452_v3  ;;  %v457_v15 = vunpack.c.h.bf16 %v451_v10 }
 0x158   :  { %1044 = vmatprep.subr.bf16.mxu0 %v4024_v9  ;;  %1087 = vmatprep.subr.bf16.mxu1 %v4044_v16  ;;  %v462_v9 = vadd.f32 %v454_v4, %v4137_v41 }
 0x159   :  { %v467_v16 = vadd.f32 %v459_v8, %v4139_v43 }
 0x15b   :  { %1045 = vmatpush1.bf16.msra.mxu0 %v4033_v12  ;;  %1088 = vmatpush1.bf16.msra.mxu1 %v4053_v19  ;;  %v466_v12 = vadd.f32 %v458_v7, %v4137_v41 }
 0x15c   :  { %1046 = vmatprep.subr.bf16.mxu0 %v4035_v13  ;;  %1089 = vmatprep.subr.bf16.mxu1 %v4056_v20  ;;  %v453_v20 = vld [vmem:[#allocation4 + $0x38] sm:$0xff] }
 0x15d   :  { %v460_v60 = vunpack.c.l.bf16 %v453_v20 }
 0x15f   :  { %1047 = vmatpush1.bf16.msra.mxu0 %v4047_v17  ;;  %1090 = vmatpush1.bf16.msra.mxu1 %v4065_v23  ;;  %v468_v33 = vadd.f32 %v460_v60, %v4147_v63  ;;  %v4259_v60 = vld [vmem:[#allocation7 + $0x8c] ss:$16 sps:$4 sm:$0xff]  }
 0x160   :  { %1048 = vmatprep.subr.bf16.mxu0 %v4050_v18  ;;  %1091 = vmatprep.subr.bf16.mxu1 %v4070_v25  ;;  %v456_v25 = vunpack.c.l.bf16 %v451_v10 }
 0x162   :  { %v464_v62 = vadd.f32 %v456_v25, %v4147_v63  ;;  %v4233_v25 = vld [vmem:[#allocation7 + $0x44] ss:$16 sps:$4 sm:$0xff]  }
 0x163   :  { %1049 = vmatpush1.bf16.msra.mxu0 %v4059_v21  ;;  %1092 = vmatpush1.bf16.msra.mxu1 %v4074_v27 }
 0x164   :  { %1050 = vmatprep.subr.bf16.mxu0 %v4061_v22  ;;  %1093 = vmatprep.subr.bf16.mxu1 %v4077_v28 }
 0x167   :  { %1051 = vmatpush1.bf16.msra.mxu0 %v4067_v24  ;;  %1094 = vmatpush1.bf16.msra.mxu1 %v4084_v30  ;;  %v465_v30 = vadd.f32 %v457_v15, %v4145_v56 }
 0x168   :  { %1052 = vmatprep.subr.bf16.mxu0 %v4072_v26  ;;  %1095 = vmatprep.subr.bf16.mxu1 %v4087_v31 }
 0x16b   :  { %1053 = vmatpush1.bf16.msra.mxu0 %v4081_v29  ;;  %1096 = vmatpush1.bf16.msra.mxu1 %v4092_v32  ;;  %v461_v32 = vunpack.c.h.bf16 %v453_v20  ;;  %v4215_v20 = vld [vmem:[#allocation7 + $0x8] ss:$16 sps:$4 sm:$0xff]  }
 0x16d   :  { %v469_v6 = vadd.f32 %v461_v32, %v4145_v56  ;;  %v4251_v32 = vld [vmem:[#allocation7 + $0x68] ss:$16 sps:$4 sm:$0xff]  }
 0x221   :  { %v697_v13 = vpop.f32.mrb[4].mxu0  ;;  %v740_v14 = vpop.f32.mrb[4].mxu1 }
 0x222   :  { %v749_v17 = vadd.f32 %v697_v13, %v462_v9  ;;  %v699_v18 = vpop.f32.mrb[5].mxu0  ;;  %v742_v19 = vpop.f32.mrb[5].mxu1  ;;  %v751_v34 = vadd.f32 %v740_v14, %v464_v62  ;;  %v4263_v62 = vld [vmem:[#allocation7 + $0x88] ss:$16 sps:$4 sm:$0xff]  }
 0x223   :  { %v750_v21 = vadd.f32 %v699_v18, %v463_v11  ;;  %v701_v22 = vpop.f32.mrb[6].mxu0  ;;  %v744_v23 = vpop.f32.mrb[6].mxu1  ;;  %v752_v1 = vadd.f32 %v742_v19, %v465_v30  ;;  %v4211_v18 = vld [vmem:[#allocation7 + $0xc] ss:$16 sps:$4 sm:$0xff]   ;;  %v4213_v19 = vld [vmem:[#allocation7] ss:$16 sps:$4 sm:$0xff]  }
 0x224   :  { %v3162_v24 = vmul.f32 -1.442695, %v749_v17  ;;  %v753_v26 = vadd.f32 %v701_v22, %v466_v12  ;;  %v703_v27 = vpop.f32.mrb[7].mxu0  ;;  %v746_v28 = vpop.f32.mrb[7].mxu1  ;;  %v755_v38 = vadd.f32 %v744_v23, %v468_v33  ;;  %1456 = vmatprep.subr.bf16.mxu1 %v4211_v18  ;;  %v4223_v22 = vld [vmem:[#allocation7 + $0x2c] ss:$16 sps:$4 sm:$0xff]  }
 0x225   :  { %v3164_v29 = vmul.f32 -1.442695, %v750_v21  ;;  %v754_v31 = vadd.f32 %v703_v27, %v467_v16  ;;  %v3166_v35 = vmul.f32 -1.442695, %v752_v1  ;;  %v756_v36 = vadd.f32 %v746_v28, %v469_v6  ;;  %v4221_v21 = vld [vmem:[#allocation7 + $0x24] ss:$16 sps:$4 sm:$0xff]  }
 0x226   :  { %3651 = vpow2.f32 %v3162_v24  ;;  %v3163_v59 = vmul.f32 -1.442695, %v753_v26  ;;  %v4225_v23 = vld [vmem:[#allocation7 + $0x20] ss:$16 sps:$4 sm:$0xff]   ;;  %v4227_v24 = vld [vmem:[#allocation7 + $0x28] ss:$16 sps:$4 sm:$0xff]  }
 0x227   :  { %3653 = vpow2.f32 %v3164_v29  ;;  %v3165_v61 = vmul.f32 -1.442695, %v754_v31  ;;  %v3167_v44 = vmul.f32 -1.442695, %v756_v36  ;;  %v4235_v26 = vld [vmem:[#allocation7 + $0x4c] ss:$16 sps:$4 sm:$0xff]  }
 0x228   :  { %3655 = vpow2.f32 %v3163_v59  ;;  %v4237_v27 = vld [vmem:[#allocation7 + $0x40] ss:$16 sps:$4 sm:$0xff]   ;;  %v4239_v28 = vld [vmem:[#allocation7 + $0x48] ss:$16 sps:$4 sm:$0xff]   ;;  %v4245_v29 = vld [vmem:[#allocation7 + $0x64] ss:$16 sps:$4 sm:$0xff]  }
 0x229   :  { %3657 = vpow2.f32 %v3165_v61  ;;  %v4247_v30 = vld [vmem:[#allocation7 + $0x6c] ss:$16 sps:$4 sm:$0xff]   ;;  %v4249_v31 = vld [vmem:[#allocation7 + $0x60] ss:$16 sps:$4 sm:$0xff]   ;;  %v4257_v59 = vld [vmem:[#allocation7 + $0x84] ss:$16 sps:$4 sm:$0xff]  }
 0x22a   :  { %3659 = vtanh.f32 %v751_v34  ;;  %v4261_v61 = vld [vmem:[#allocation7 + $0x80] ss:$16 sps:$4 sm:$0xff]   ;;  %v4267_v1 = vld [vmem:[#allocation7 + $0xa4] ss:$16 sps:$4 sm:$0xff]   ;;  %v4269_v6 = vld [vmem:[#allocation7 + $0xac] ss:$16 sps:$4 sm:$0xff]  }
 0x22b   :  { %3661 = vpow2.f32 %v3166_v35  ;;  %v4273_v33 = vld [vmem:[#allocation7 + $0xa0] ss:$16 sps:$4 sm:$0xff]   ;;  %v4275_v34 = vld [vmem:[#allocation7 + $0xa8] ss:$16 sps:$4 sm:$0xff]   ;;  %v4279_v35 = vld [vmem:[#allocation7 + $0xc4] ss:$16 sps:$4 sm:$0xff]  }
 0x22c   :  { %3663 = vtanh.f32 %v755_v38  ;;  %v4281_v36 = vld [vmem:[#allocation7 + $0xcc] ss:$16 sps:$4 sm:$0xff]   ;;  %v4285_v38 = vld [vmem:[#allocation7 + $0xc0] ss:$16 sps:$4 sm:$0xff]  }
 0x230   :  { %v3652_v39 = vpop.eup %3651 }
 0x231   :  { %v3654_v40 = vpop.eup %3653  ;;  %v763_v42 = vadd.f32 1.0, %v3652_v39  ;;  %v4287_v39 = vld [vmem:[#allocation7 + $0xc8] ss:$16 sps:$4 sm:$0xff]  }
 0x232   :  { %v775_v45 = vadd.f32 1.0, %v3654_v40  ;;  %v3656_v46 = vpop.eup %3655  ;;  %v4291_v40 = vld [vmem:[#allocation7 + $0xe4] ss:$16 sps:$4 sm:$0xff]  }
 0x233   :  { %3665 = vrcp.f32 %v763_v42  ;;  %v764_v37 = vadd.f32 1.0, %v3656_v46  ;;  %v3658_v47 = vpop.eup %3657  ;;  %v4293_v42 = vld [vmem:[#allocation7 + $0xec] ss:$16 sps:$4 sm:$0xff]   ;;  %v825_v46 = vld [vmem:[#allocation4 + $0x40] sm:$0xff] }
 0x234   :  { %3667 = vrcp.f32 %v775_v45  ;;  %v776_v48 = vadd.f32 1.0, %v3658_v47  ;;  %v3660_v51 = vpop.eup %3659  ;;  %v4299_v45 = vld [vmem:[#allocation7 + $0xe8] ss:$16 sps:$4 sm:$0xff]   ;;  %v829_v47 = vunpack.c.l.bf16 %v825_v46 }
 0x235   :  { %3669 = vpow2.f32 %v3167_v44  ;;  %v3662_v52 = vpop.eup %3661  ;;  %v4297_v44 = vld [vmem:[#allocation7 + $0xe0] ss:$16 sps:$4 sm:$0xff]  }
 0x236   :  { %3671 = vrcp.f32 %v764_v37  ;;  %v3664_v53 = vpop.eup %3663  ;;  %v789_v4 = vadd.f32 1.0, %v3662_v52  ;;  %v827_v37 = vld [vmem:[#allocation4 + $0x50] sm:$0xff] }
 0x237   :  { %3673 = vrcp.f32 %v776_v48  ;;  %v830_v48 = vunpack.c.h.bf16 %v825_v46  ;;  %v834_v52 = vunpack.c.h.bf16 %v827_v37 }
 0x238   :  { %3675 = vrcp.f32 %v789_v4 }
 0x239   :  { %v842_v4 = vadd.f32 %v834_v52, %v4139_v43 }
 0x23d   :  { %v3666_v54 = vpop.eup %3665 }
 0x23e   :  { %v3668_v55 = vpop.eup %3667  ;;  %v799_v57 = vmul.f32 %v3666_v54, %v3660_v51  ;;  %v833_v51 = vunpack.c.l.bf16 %v827_v37  ;;  %v826_v54 = vld [vmem:[#allocation4 + $0x48] sm:$0xff] }
 0x23f   :  { %v3670_v58 = vpop.eup %3669  ;;  %v797_v2 = vmul.f32 %v3668_v55, %v4153_v49  ;;  %v838_v55 = vadd.f32 %v830_v48, %v4139_v43 }
 0x240   :  { %v3672_v3 = vpop.eup %3671  ;;  %v790_v9 = vadd.f32 1.0, %v3670_v58 }
 0x241   :  { %v4200_v5 = vadd.f32 %v799_v57, %v797_v2  ;;  %v800_v7 = vmul.f32 %v3672_v3, %v3664_v53  ;;  %v3674_v8 = vpop.eup %3673  ;;  %v837_v53 = vadd.f32 %v829_v47, %v4137_v41  ;;  %v841_v57 = vadd.f32 %v833_v51, %v4137_v41 }
 0x242   :  { %v798_v10 = vmul.f32 %v3674_v8, %v4156_v50  ;;  %v3676_v12 = vpop.eup %3675  ;;  %v4209_v50 = vld [vmem:[#allocation7 + $0x4] ss:$16 sps:$4 sm:$0xff]   ;;  %v832_v3 = vunpack.c.h.bf16 %v826_v54 }
 0x243   :  { %3677 = vtanh.f32 %v4200_v5  ;;  %1413 = vmatprep.subr.bf16.mxu0 %v4209_v50 }
 0x244   :  { %v4204_v11 = vadd.f32 %v800_v7, %v798_v10  ;;  %3679 = vrcp.f32 %v790_v9  ;;  %v828_v10 = vld [vmem:[#allocation4 + $0x58] sm:$0xff]  ;;  %v840_v47 = vadd.f32 %v832_v3, %v4145_v56 }
 0x245   :  { %v836_v51 = vunpack.c.h.bf16 %v828_v10  ;;  %v835_v52 = vunpack.c.l.bf16 %v828_v10 }
 0x246   :  { %3681 = vtanh.f32 %v4204_v11 }
 0x24d   :  { %v3678_v13 = vpop.eup %3677 }
 0x24e   :  { %v3680_v49 = vpop.eup %3679  ;;  %v805_v15 = vmul.f32 %v3678_v13, %v3676_v12 }
 0x250   :  { %v3682_v14 = vpop.eup %3681 }
 0x251   :  { %v806_v16 = vmul.f32 %v3682_v14, %v3680_v49 }
 0x253   :  { %v3434_v17 = vpack.c.bf16 %v806_v16, %v805_v15  ;;  %v831_v15 = vunpack.c.l.bf16 %v826_v54  ;;  %v843_v54 = vadd.f32 %v835_v52, %v4147_v63 }
 0x255   :  { %3435 = vst [vmem:[#allocation9 + $0x8] sm:$0xff] %v3434_v17   ;;  %1071 = vmatmul.mubr.bf16.vlgmr.msra.gmra.mrb[8].mxu0 %v3434_v17  ;;  %1114 = vmatmul.mubr.bf16.vlgmr.msra.gmra.mrb[8].mxu1 %v3434_v17 }
 0x256   :  { %1445 = vmatprep.mubr.bf16.mxu0 %v4611_v0  ;;  %1488 = vmatprep.mubr.bf16.mxu1 %v4611_v0 }
 0x257   :  { %1414 = vmatpush1.bf16.msra.mxu0 %v4213_v19  ;;  %1457 = vmatpush1.bf16.msra.mxu1 %v4215_v20 }
 0x258   :  { %1415 = vmatprep.subr.bf16.mxu0 %v4221_v21  ;;  %1458 = vmatprep.subr.bf16.mxu1 %v4223_v22 }
 0x25b   :  { %1416 = vmatpush1.bf16.msra.mxu0 %v4225_v23  ;;  %1459 = vmatpush1.bf16.msra.mxu1 %v4227_v24 }
 0x25c   :  { %1417 = vmatprep.subr.bf16.mxu0 %v4233_v25  ;;  %1460 = vmatprep.subr.bf16.mxu1 %v4235_v26 }
 0x25f   :  { %1418 = vmatpush1.bf16.msra.mxu0 %v4237_v27  ;;  %1461 = vmatpush1.bf16.msra.mxu1 %v4239_v28 }
 0x260   :  { %1419 = vmatprep.subr.bf16.mxu0 %v4245_v29  ;;  %1462 = vmatprep.subr.bf16.mxu1 %v4247_v30 }
 0x263   :  { %1420 = vmatpush1.bf16.msra.mxu0 %v4249_v31  ;;  %1463 = vmatpush1.bf16.msra.mxu1 %v4251_v32 }
 0x264   :  { %1421 = vmatprep.subr.bf16.mxu0 %v4257_v59  ;;  %1464 = vmatprep.subr.bf16.mxu1 %v4259_v60 }
 0x267   :  { %1422 = vmatpush1.bf16.msra.mxu0 %v4261_v61  ;;  %1465 = vmatpush1.bf16.msra.mxu1 %v4263_v62 }
 0x268   :  { %1423 = vmatprep.subr.bf16.mxu0 %v4267_v1  ;;  %1466 = vmatprep.subr.bf16.mxu1 %v4269_v6 }
 0x26b   :  { %1424 = vmatpush1.bf16.msra.mxu0 %v4273_v33  ;;  %1467 = vmatpush1.bf16.msra.mxu1 %v4275_v34 }
 0x26c   :  { %1425 = vmatprep.subr.bf16.mxu0 %v4279_v35  ;;  %1468 = vmatprep.subr.bf16.mxu1 %v4281_v36 }
 0x26f   :  { %1426 = vmatpush1.bf16.msra.mxu0 %v4285_v38  ;;  %1469 = vmatpush1.bf16.msra.mxu1 %v4287_v39 }
 0x270   :  { %1427 = vmatprep.subr.bf16.mxu0 %v4291_v40  ;;  %1470 = vmatprep.subr.bf16.mxu1 %v4293_v42 }
 0x273   :  { %1428 = vmatpush1.bf16.msra.mxu0 %v4297_v44  ;;  %1471 = vmatpush1.bf16.msra.mxu1 %v4299_v45 }
 0x274   :  { %1788 = vmatprep.subr.bf16.mxu0 %v4209_v50  ;;  %1831 = vmatprep.subr.bf16.mxu1 %v4211_v18 }
 0x328   :  { %v1072_v58 = vpop.f32.mrb[8].mxu0  ;;  %v1115_v2 = vpop.f32.mrb[8].mxu1 }
 0x329   :  { %v1124_v7 = vadd.f32 %v1072_v58, %v837_v53  ;;  %v1074_v8 = vpop.f32.mrb[9].mxu0  ;;  %v1117_v9 = vpop.f32.mrb[9].mxu1  ;;  %v839_v58 = vadd.f32 %v831_v15, %v4147_v63 }
 0x32a   :  { %v1125_v12 = vadd.f32 %v1074_v8, %v838_v55  ;;  %v1076_v13 = vpop.f32.mrb[10].mxu0  ;;  %v1119_v49 = vpop.f32.mrb[10].mxu1  ;;  %v1127_v55 = vadd.f32 %v1117_v9, %v840_v47 }
 0x32b   :  { %v3202_v14 = vmul.f32 -1.442695, %v1124_v7  ;;  %v1128_v16 = vadd.f32 %v1076_v13, %v841_v57  ;;  %v1078_v17 = vpop.f32.mrb[11].mxu0  ;;  %v1121_v46 = vpop.f32.mrb[11].mxu1  ;;  %v844_v7 = vadd.f32 %v836_v51, %v4145_v56  ;;  %v1126_v57 = vadd.f32 %v1115_v2, %v839_v58 }
 0x32c   :  { %v3204_v37 = vmul.f32 -1.442695, %v1125_v12  ;;  %v1129_v48 = vadd.f32 %v1078_v17, %v842_v4  ;;  %v3206_v8 = vmul.f32 -1.442695, %v1127_v55  ;;  %v1130_v3 = vadd.f32 %v1119_v49, %v843_v54 }
 0x32d   :  { %3683 = vpow2.f32 %v3202_v14  ;;  %v3203_v0 = vmul.f32 -1.442695, %v1128_v16  ;;  %v1131_v12 = vadd.f32 %v1121_v46, %v844_v7 }
 0x32e   :  { %3685 = vpow2.f32 %v3204_v37  ;;  %v3205_v53 = vmul.f32 -1.442695, %v1129_v48 }
 0x32f   :  { %3687 = vpow2.f32 %v3203_v0  ;;  %v3207_v10 = vmul.f32 -1.442695, %v1131_v12 }
 0x330   :  { %3689 = vpow2.f32 %v3205_v53 }
 0x331   :  { %3691 = vtanh.f32 %v1126_v57 }
 0x332   :  { %3693 = vpow2.f32 %v3206_v8 }
 0x333   :  { %3695 = vtanh.f32 %v1130_v3 }
 0x337   :  { %v3684_v4 = vpop.eup %3683 }
 0x338   :  { %v3686_v13 = vpop.eup %3685  ;;  %v1138_v14 = vadd.f32 1.0, %v3684_v4 }
 0x339   :  { %v1150_v16 = vadd.f32 1.0, %v3686_v13  ;;  %v3688_v15 = vpop.eup %3687 }
 0x33a   :  { %3697 = vrcp.f32 %v1138_v14  ;;  %v1139_v0 = vadd.f32 1.0, %v3688_v15  ;;  %v3690_v9 = vpop.eup %3689  ;;  %v1200_v15 = vld [vmem:[#allocation4 + $0x60] sm:$0xff] }
 0x33b   :  { %3699 = vrcp.f32 %v1150_v16  ;;  %v1151_v17 = vadd.f32 1.0, %v3690_v9  ;;  %v3692_v2 = vpop.eup %3691  ;;  %v1204_v9 = vunpack.c.l.bf16 %v1200_v15 }
 0x33c   :  { %3701 = vpow2.f32 %v3207_v10  ;;  %v3694_v46 = vpop.eup %3693 }
 0x33d   :  { %3703 = vrcp.f32 %v1139_v0  ;;  %v3696_v49 = vpop.eup %3695  ;;  %v1164_v58 = vadd.f32 1.0, %v3694_v46  ;;  %v1202_v0 = vld [vmem:[#allocation4 + $0x70] sm:$0xff] }
 0x33e   :  { %3705 = vrcp.f32 %v1151_v17  ;;  %v1205_v17 = vunpack.c.h.bf16 %v1200_v15  ;;  %v1209_v46 = vunpack.c.h.bf16 %v1202_v0 }
 0x33f   :  { %3707 = vrcp.f32 %v1164_v58 }
 0x344   :  { %v3698_v37 = vpop.eup %3697 }
 0x345   :  { %v3700_v47 = vpop.eup %3699  ;;  %v1174_v48 = vmul.f32 %v3698_v37, %v3692_v2  ;;  %v1208_v2 = vunpack.c.l.bf16 %v1202_v0  ;;  %v1201_v37 = vld [vmem:[#allocation4 + $0x68] sm:$0xff] }
 0x346   :  { %v3702_v51 = vpop.eup %3701  ;;  %v1172_v52 = vmul.f32 %v3700_v47, %v4200_v5  ;;  %v1213_v47 = vadd.f32 %v1205_v17, %v4139_v43 }
 0x347   :  { %v3704_v53 = vpop.eup %3703  ;;  %v1165_v57 = vadd.f32 1.0, %v3702_v51 }
 0x348   :  { %v4316_v55 = vadd.f32 %v1174_v48, %v1172_v52  ;;  %v1175_v7 = vmul.f32 %v3704_v53, %v3696_v49  ;;  %v3706_v54 = vpop.eup %3705  ;;  %v1212_v49 = vadd.f32 %v1204_v9, %v4137_v41  ;;  %v1216_v48 = vadd.f32 %v1208_v2, %v4137_v41 }
 0x349   :  { %v1173_v8 = vmul.f32 %v3706_v54, %v4204_v11  ;;  %v3708_v3 = vpop.eup %3707  ;;  %v4613_v11 = vmov 0   ;;  %v1207_v53 = vunpack.c.h.bf16 %v1201_v37  ;;  %v1203_v54 = vld [vmem:[#allocation4 + $0x78] sm:$0xff] }
 0x34a   :  { %3709 = vtanh.f32 %v4316_v55  ;;  %v1211_v9 = vunpack.c.h.bf16 %v1203_v54  ;;  %v1210_v2 = vunpack.c.l.bf16 %v1203_v54 }
 0x34b   :  { %v4320_v12 = vadd.f32 %v1175_v7, %v1173_v8  ;;  %3711 = vrcp.f32 %v1165_v57  ;;  %v1215_v15 = vadd.f32 %v1207_v53, %v4145_v56 }
 0x34d   :  { %3713 = vtanh.f32 %v4320_v12 }
 0x354   :  { %v3710_v4 = vpop.eup %3709 }
 0x355   :  { %v3712_v5 = vpop.eup %3711  ;;  %v1180_v14 = vmul.f32 %v3710_v4, %v3708_v3 }
 0x357   :  { %v3714_v13 = vpop.eup %3713 }
 0x358   :  { %v1181_v10 = vmul.f32 %v3714_v13, %v3712_v5  ;;  %v1206_v5 = vunpack.c.l.bf16 %v1201_v37  ;;  %v1218_v37 = vadd.f32 %v1210_v2, %v4147_v63 }
 0x35a   :  { %v3439_v16 = vpack.c.bf16 %v1181_v10, %v1180_v14 }
 0x35c   :  { %3440 = vst [vmem:[#allocation9 + $0x10] sm:$0xff] %v3439_v16   ;;  %1446 = vmatmul.mubr.bf16.vlgmr.msra.gmra.mrb[12].mxu0 %v3439_v16  ;;  %1489 = vmatmul.mubr.bf16.vlgmr.msra.gmra.mrb[12].mxu1 %v3439_v16 }
 0x35d   :  { %1789 = vmatpush1.bf16.msra.mxu0 %v4213_v19  ;;  %1832 = vmatpush1.bf16.msra.mxu1 %v4215_v20 }
 0x35e   :  { %1790 = vmatprep.subr.bf16.mxu0 %v4221_v21  ;;  %1833 = vmatprep.subr.bf16.mxu1 %v4223_v22 }
 0x35f   :  { %1820 = vmatprep.mubr.bf16.mxu0 %v4613_v11  ;;  %1863 = vmatprep.mubr.bf16.mxu1 %v4613_v11 }
 0x361   :  { %1791 = vmatpush1.bf16.msra.mxu0 %v4225_v23  ;;  %1834 = vmatpush1.bf16.msra.mxu1 %v4227_v24 }
 0x362   :  { %1792 = vmatprep.subr.bf16.mxu0 %v4233_v25  ;;  %1835 = vmatprep.subr.bf16.mxu1 %v4235_v26 }
 0x365   :  { %1793 = vmatpush1.bf16.msra.mxu0 %v4237_v27  ;;  %1836 = vmatpush1.bf16.msra.mxu1 %v4239_v28 }
 0x366   :  { %1794 = vmatprep.subr.bf16.mxu0 %v4245_v29  ;;  %1837 = vmatprep.subr.bf16.mxu1 %v4247_v30 }
 0x369   :  { %1795 = vmatpush1.bf16.msra.mxu0 %v4249_v31  ;;  %1838 = vmatpush1.bf16.msra.mxu1 %v4251_v32 }
 0x36a   :  { %1796 = vmatprep.subr.bf16.mxu0 %v4257_v59  ;;  %1839 = vmatprep.subr.bf16.mxu1 %v4259_v60 }
 0x36d   :  { %1797 = vmatpush1.bf16.msra.mxu0 %v4261_v61  ;;  %1840 = vmatpush1.bf16.msra.mxu1 %v4263_v62 }
 0x36e   :  { %1798 = vmatprep.subr.bf16.mxu0 %v4267_v1  ;;  %1841 = vmatprep.subr.bf16.mxu1 %v4269_v6 }
 0x371   :  { %1799 = vmatpush1.bf16.msra.mxu0 %v4273_v33  ;;  %1842 = vmatpush1.bf16.msra.mxu1 %v4275_v34 }
 0x372   :  { %1800 = vmatprep.subr.bf16.mxu0 %v4279_v35  ;;  %1843 = vmatprep.subr.bf16.mxu1 %v4281_v36 }
 0x375   :  { %1801 = vmatpush1.bf16.msra.mxu0 %v4285_v38  ;;  %1844 = vmatpush1.bf16.msra.mxu1 %v4287_v39 }
 0x376   :  { %1802 = vmatprep.subr.bf16.mxu0 %v4291_v40  ;;  %1845 = vmatprep.subr.bf16.mxu1 %v4293_v42 }
 0x379   :  { %1803 = vmatpush1.bf16.msra.mxu0 %v4297_v44  ;;  %1846 = vmatpush1.bf16.msra.mxu1 %v4299_v45 }
 0x37a   :  { %2163 = vmatprep.subr.bf16.mxu0 %v4209_v50  ;;  %2206 = vmatprep.subr.bf16.mxu1 %v4211_v18  ;;  %v1217_v50 = vadd.f32 %v1209_v46, %v4139_v43 }
 0x42f   :  { %v1447_v51 = vpop.f32.mrb[12].mxu0  ;;  %v1490_v52 = vpop.f32.mrb[12].mxu1 }
 0x430   :  { %v1499_v58 = vadd.f32 %v1447_v51, %v1212_v49  ;;  %v1449_v18 = vpop.f32.mrb[13].mxu0  ;;  %v1492_v7 = vpop.f32.mrb[13].mxu1  ;;  %v1214_v49 = vadd.f32 %v1206_v5, %v4147_v63  ;;  %v1219_v51 = vadd.f32 %v1211_v9, %v4145_v56 }
 0x431   :  { %v1500_v57 = vadd.f32 %v1449_v18, %v1213_v47  ;;  %v1451_v8 = vpop.f32.mrb[14].mxu0  ;;  %v1494_v3 = vpop.f32.mrb[14].mxu1  ;;  %v1502_v47 = vadd.f32 %v1492_v7, %v1215_v15 }
 0x432   :  { %v3242_v4 = vmul.f32 -1.442695, %v1499_v58  ;;  %v1503_v13 = vadd.f32 %v1451_v8, %v1216_v48  ;;  %v1453_v14 = vpop.f32.mrb[15].mxu0  ;;  %v1496_v10 = vpop.f32.mrb[15].mxu1  ;;  %v1501_v48 = vadd.f32 %v1490_v52, %v1214_v49  ;;  %v1505_v53 = vadd.f32 %v1494_v3, %v1218_v37 }
 0x433   :  { %v3244_v16 = vmul.f32 -1.442695, %v1500_v57  ;;  %v1504_v0 = vadd.f32 %v1453_v14, %v1217_v50  ;;  %v3246_v58 = vmul.f32 -1.442695, %v1502_v47  ;;  %v1506_v18 = vadd.f32 %v1496_v10, %v1219_v51 }
 0x434   :  { %3715 = vpow2.f32 %v3242_v4  ;;  %v3243_v17 = vmul.f32 -1.442695, %v1503_v13 }
 0x435   :  { %3717 = vpow2.f32 %v3244_v16  ;;  %v3245_v46 = vmul.f32 -1.442695, %v1504_v0  ;;  %v3247_v54 = vmul.f32 -1.442695, %v1506_v18 }
 0x436   :  { %3719 = vpow2.f32 %v3243_v17 }
 0x437   :  { %3721 = vpow2.f32 %v3245_v46 }
 0x438   :  { %3723 = vtanh.f32 %v1501_v48 }
 0x439   :  { %3725 = vpow2.f32 %v3246_v58 }
 0x43a   :  { %3727 = vtanh.f32 %v1505_v53 }
 0x43e   :  { %v3716_v50 = vpop.eup %3715 }
 0x43f   :  { %v3718_v57 = vpop.eup %3717  ;;  %v1513_v8 = vadd.f32 1.0, %v3716_v50 }
 0x440   :  { %v1525_v4 = vadd.f32 1.0, %v3718_v57  ;;  %v3720_v5 = vpop.eup %3719 }
 0x441   :  { %3729 = vrcp.f32 %v1513_v8  ;;  %v1514_v7 = vadd.f32 1.0, %v3720_v5  ;;  %v3722_v13 = vpop.eup %3721 }
 0x442   :  { %3731 = vrcp.f32 %v1525_v4  ;;  %v1526_v14 = vadd.f32 1.0, %v3722_v13  ;;  %v3724_v52 = vpop.eup %3723 }
 0x443   :  { %3733 = vpow2.f32 %v3247_v54  ;;  %v3726_v10 = vpop.eup %3725 }
 0x444   :  { %3735 = vrcp.f32 %v1514_v7  ;;  %v3728_v3 = vpop.eup %3727  ;;  %v1539_v46 = vadd.f32 1.0, %v3726_v10 }
 0x445   :  { %3737 = vrcp.f32 %v1526_v14 }
 0x446   :  { %3739 = vrcp.f32 %v1539_v46 }
 0x44b   :  { %v3730_v16 = vpop.eup %3729 }
 0x44c   :  { %v3732_v15 = vpop.eup %3731  ;;  %v1549_v0 = vmul.f32 %v3730_v16, %v3724_v52 }
 0x44d   :  { %v3734_v9 = vpop.eup %3733  ;;  %v1547_v17 = vmul.f32 %v3732_v15, %v4316_v55 }
 0x44e   :  { %v3736_v2 = vpop.eup %3735  ;;  %v1540_v37 = vadd.f32 1.0, %v3734_v9 }
 0x44f   :  { %v4366_v49 = vadd.f32 %v1549_v0, %v1547_v17  ;;  %v1550_v47 = vmul.f32 %v3736_v2, %v3728_v3  ;;  %v3738_v51 = vpop.eup %3737 }
 0x450   :  { %v1548_v48 = vmul.f32 %v3738_v51, %v4320_v12  ;;  %v3740_v18 = vpop.eup %3739 }
 0x451   :  { %3741 = vtanh.f32 %v4366_v49 }
 0x452   :  { %v4370_v58 = vadd.f32 %v1550_v47, %v1548_v48  ;;  %3743 = vrcp.f32 %v1540_v37 }
 0x454   :  { %3745 = vtanh.f32 %v4370_v58 }
 0x45b   :  { %v3742_v53 = vpop.eup %3741 }
 0x45c   :  { %v3744_v55 = vpop.eup %3743  ;;  %v1555_v57 = vmul.f32 %v3742_v53, %v3740_v18 }
 0x45e   :  { %v3746_v50 = vpop.eup %3745 }
 0x45f   :  { %v1556_v8 = vmul.f32 %v3746_v50, %v3744_v55 }
 0x461   :  { %v3444_v54 = vpack.c.bf16 %v1556_v8, %v1555_v57 }
 0x463   :  { %3445 = vst [vmem:[#allocation9 + $0x18] sm:$0xff] %v3444_v54   ;;  %1821 = vmatmul.mubr.bf16.vlgmr.msra.gmra.mrb[16].mxu0 %v3444_v54  ;;  %1864 = vmatmul.mubr.bf16.vlgmr.msra.gmra.mrb[16].mxu1 %v3444_v54 }
 0x464   :  { %2164 = vmatpush1.bf16.msra.mxu0 %v4213_v19  ;;  %2207 = vmatpush1.bf16.msra.mxu1 %v4215_v20  ;;  %v1575_v19 = vld [vmem:[#allocation4 + $0x80] sm:$0xff]  ;;  %v1577_v20 = vld [vmem:[#allocation4 + $0x90] sm:$0xff] }
 0x465   :  { %2165 = vmatprep.subr.bf16.mxu0 %v4221_v21  ;;  %2208 = vmatprep.subr.bf16.mxu1 %v4223_v22  ;;  %v1579_v21 = vunpack.c.l.bf16 %v1575_v19  ;;  %v1580_v22 = vunpack.c.h.bf16 %v1575_v19 }
 0x466   :  { %2195 = vmatprep.mubr.bf16.mxu0 %v4613_v11  ;;  %2238 = vmatprep.mubr.bf16.mxu1 %v4613_v11 }
 0x468   :  { %2166 = vmatpush1.bf16.msra.mxu0 %v4225_v23  ;;  %2209 = vmatpush1.bf16.msra.mxu1 %v4227_v24  ;;  %v1583_v23 = vunpack.c.l.bf16 %v1577_v20  ;;  %v1584_v24 = vunpack.c.h.bf16 %v1577_v20 }
 0x469   :  { %2167 = vmatprep.subr.bf16.mxu0 %v4233_v25  ;;  %2210 = vmatprep.subr.bf16.mxu1 %v4235_v26  ;;  %v1587_v25 = vadd.f32 %v1579_v21, %v4137_v41  ;;  %v1576_v26 = vld [vmem:[#allocation4 + $0x88] sm:$0xff] }
 0x46c   :  { %2168 = vmatpush1.bf16.msra.mxu0 %v4237_v27  ;;  %2211 = vmatpush1.bf16.msra.mxu1 %v4239_v28  ;;  %v1588_v27 = vadd.f32 %v1580_v22, %v4139_v43  ;;  %v1591_v28 = vadd.f32 %v1583_v23, %v4137_v41 }
 0x46d   :  { %2169 = vmatprep.subr.bf16.mxu0 %v4245_v29  ;;  %2212 = vmatprep.subr.bf16.mxu1 %v4247_v30 }
 0x470   :  { %2170 = vmatpush1.bf16.msra.mxu0 %v4249_v31  ;;  %2213 = vmatpush1.bf16.msra.mxu1 %v4251_v32  ;;  %v1582_v31 = vunpack.c.h.bf16 %v1576_v26  ;;  %v1592_v32 = vadd.f32 %v1584_v24, %v4139_v43 }
 0x471   :  { %2171 = vmatprep.subr.bf16.mxu0 %v4257_v59  ;;  %2214 = vmatprep.subr.bf16.mxu1 %v4259_v60 }
 0x474   :  { %2172 = vmatpush1.bf16.msra.mxu0 %v4261_v61  ;;  %2215 = vmatpush1.bf16.msra.mxu1 %v4263_v62  ;;  %v1578_v62 = vld [vmem:[#allocation4 + $0x98] sm:$0xff] }
 0x475   :  { %2173 = vmatprep.subr.bf16.mxu0 %v4267_v1  ;;  %2216 = vmatprep.subr.bf16.mxu1 %v4269_v6  ;;  %v1585_v4 = vunpack.c.l.bf16 %v1578_v62 }
 0x477   :  { %v1593_v52 = vadd.f32 %v1585_v4, %v4147_v63  ;;  %v4473_v4 = vld [vmem:[#allocation7 + $0x8c] ss:$16 sps:$4 sm:$0xff]  }
 0x478   :  { %2174 = vmatpush1.bf16.msra.mxu0 %v4273_v33  ;;  %2217 = vmatpush1.bf16.msra.mxu1 %v4275_v34 }
 0x479   :  { %2175 = vmatprep.subr.bf16.mxu0 %v4279_v35  ;;  %2218 = vmatprep.subr.bf16.mxu1 %v4281_v36  ;;  %v1581_v35 = vunpack.c.l.bf16 %v1576_v26 }
 0x47b   :  { %v1589_v7 = vadd.f32 %v1581_v35, %v4147_v63  ;;  %v4447_v35 = vld [vmem:[#allocation7 + $0x44] ss:$16 sps:$4 sm:$0xff]  }
 0x47c   :  { %2176 = vmatpush1.bf16.msra.mxu0 %v4285_v38  ;;  %2219 = vmatpush1.bf16.msra.mxu1 %v4287_v39 }
 0x47d   :  { %2177 = vmatprep.subr.bf16.mxu0 %v4291_v40  ;;  %2220 = vmatprep.subr.bf16.mxu1 %v4293_v42  ;;  %v1590_v42 = vadd.f32 %v1582_v31, %v4145_v56 }
 0x480   :  { %2178 = vmatpush1.bf16.msra.mxu0 %v4297_v44  ;;  %2221 = vmatpush1.bf16.msra.mxu1 %v4299_v45  ;;  %v1586_v45 = vunpack.c.h.bf16 %v1578_v62  ;;  %v4429_v62 = vld [vmem:[#allocation7 + $0x8] ss:$16 sps:$4 sm:$0xff]  }
 0x482   :  { %v1594_v14 = vadd.f32 %v1586_v45, %v4145_v56  ;;  %v4465_v45 = vld [vmem:[#allocation7 + $0x68] ss:$16 sps:$4 sm:$0xff]  }
 0x536   :  { %v1822_v29 = vpop.f32.mrb[16].mxu0  ;;  %v1865_v30 = vpop.f32.mrb[16].mxu1 }
 0x537   :  { %v1874_v59 = vadd.f32 %v1822_v29, %v1587_v25  ;;  %v1824_v60 = vpop.f32.mrb[17].mxu0  ;;  %v1867_v61 = vpop.f32.mrb[17].mxu1  ;;  %v1876_v10 = vadd.f32 %v1865_v30, %v1589_v7  ;;  %v4477_v7 = vld [vmem:[#allocation7 + $0x88] ss:$16 sps:$4 sm:$0xff]  }
 0x538   :  { %v1875_v1 = vadd.f32 %v1824_v60, %v1588_v27  ;;  %v1826_v6 = vpop.f32.mrb[18].mxu0  ;;  %v1869_v33 = vpop.f32.mrb[18].mxu1  ;;  %v1877_v13 = vadd.f32 %v1867_v61, %v1590_v42  ;;  %v4425_v60 = vld [vmem:[#allocation7 + $0xc] ss:$16 sps:$4 sm:$0xff]   ;;  %v4427_v61 = vld [vmem:[#allocation7] ss:$16 sps:$4 sm:$0xff]  }
 0x539   :  { %v3282_v34 = vmul.f32 -1.442695, %v1874_v59  ;;  %v1878_v36 = vadd.f32 %v1826_v6, %v1591_v28  ;;  %v1828_v38 = vpop.f32.mrb[19].mxu0  ;;  %v1871_v39 = vpop.f32.mrb[19].mxu1  ;;  %v1880_v15 = vadd.f32 %v1869_v33, %v1593_v52  ;;  %2581 = vmatprep.subr.bf16.mxu1 %v4425_v60  ;;  %v4437_v6 = vld [vmem:[#allocation7 + $0x2c] ss:$16 sps:$4 sm:$0xff]  }
 0x53a   :  { %v3284_v40 = vmul.f32 -1.442695, %v1875_v1  ;;  %v1879_v44 = vadd.f32 %v1828_v38, %v1592_v32  ;;  %v3286_v3 = vmul.f32 -1.442695, %v1877_v13  ;;  %v1881_v16 = vadd.f32 %v1871_v39, %v1594_v14  ;;  %v4435_v1 = vld [vmem:[#allocation7 + $0x24] ss:$16 sps:$4 sm:$0xff]  }
 0x53b   :  { %3747 = vpow2.f32 %v3282_v34  ;;  %v3283_v12 = vmul.f32 -1.442695, %v1878_v36  ;;  %v4439_v33 = vld [vmem:[#allocation7 + $0x20] ss:$16 sps:$4 sm:$0xff]   ;;  %v4441_v34 = vld [vmem:[#allocation7 + $0x28] ss:$16 sps:$4 sm:$0xff]  }
 0x53c   :  { %3749 = vpow2.f32 %v3284_v40  ;;  %v3285_v5 = vmul.f32 -1.442695, %v1879_v44  ;;  %v3287_v2 = vmul.f32 -1.442695, %v1881_v16  ;;  %v4449_v36 = vld [vmem:[#allocation7 + $0x4c] ss:$16 sps:$4 sm:$0xff]  }
 0x53d   :  { %3751 = vpow2.f32 %v3283_v12  ;;  %v4451_v38 = vld [vmem:[#allocation7 + $0x40] ss:$16 sps:$4 sm:$0xff]   ;;  %v4453_v39 = vld [vmem:[#allocation7 + $0x48] ss:$16 sps:$4 sm:$0xff]   ;;  %v4459_v40 = vld [vmem:[#allocation7 + $0x64] ss:$16 sps:$4 sm:$0xff]  }
 0x53e   :  { %3753 = vpow2.f32 %v3285_v5  ;;  %v4461_v42 = vld [vmem:[#allocation7 + $0x6c] ss:$16 sps:$4 sm:$0xff]   ;;  %v4463_v44 = vld [vmem:[#allocation7 + $0x60] ss:$16 sps:$4 sm:$0xff]   ;;  %v4471_v12 = vld [vmem:[#allocation7 + $0x84] ss:$16 sps:$4 sm:$0xff]  }
 0x53f   :  { %3755 = vtanh.f32 %v1876_v10  ;;  %v4475_v5 = vld [vmem:[#allocation7 + $0x80] ss:$16 sps:$4 sm:$0xff]   ;;  %v4481_v13 = vld [vmem:[#allocation7 + $0xa4] ss:$16 sps:$4 sm:$0xff]   ;;  %v4483_v14 = vld [vmem:[#allocation7 + $0xac] ss:$16 sps:$4 sm:$0xff]  }
 0x540   :  { %3757 = vpow2.f32 %v3286_v3  ;;  %v4487_v52 = vld [vmem:[#allocation7 + $0xa0] ss:$16 sps:$4 sm:$0xff]   ;;  %v4489_v10 = vld [vmem:[#allocation7 + $0xa8] ss:$16 sps:$4 sm:$0xff]   ;;  %v4493_v3 = vld [vmem:[#allocation7 + $0xc4] ss:$16 sps:$4 sm:$0xff]  }
 0x541   :  { %3759 = vtanh.f32 %v1880_v15  ;;  %v4495_v16 = vld [vmem:[#allocation7 + $0xcc] ss:$16 sps:$4 sm:$0xff]   ;;  %v4499_v15 = vld [vmem:[#allocation7 + $0xc0] ss:$16 sps:$4 sm:$0xff]  }
 0x545   :  { %v3748_v0 = vpop.eup %3747 }
 0x546   :  { %v3750_v9 = vpop.eup %3749  ;;  %v1888_v17 = vadd.f32 1.0, %v3748_v0  ;;  %v4501_v0 = vld [vmem:[#allocation7 + $0xc8] ss:$16 sps:$4 sm:$0xff]  }
 0x547   :  { %v1900_v46 = vadd.f32 1.0, %v3750_v9  ;;  %v3752_v47 = vpop.eup %3751  ;;  %v4505_v9 = vld [vmem:[#allocation7 + $0xe4] ss:$16 sps:$4 sm:$0xff]  }
 0x548   :  { %3761 = vrcp.f32 %v1888_v17  ;;  %v1889_v51 = vadd.f32 1.0, %v3752_v47  ;;  %v3754_v37 = vpop.eup %3753  ;;  %v4507_v17 = vld [vmem:[#allocation7 + $0xec] ss:$16 sps:$4 sm:$0xff]   ;;  %v1950_v47 = vld [vmem:[#allocation4 + $0xa0] sm:$0xff] }
 0x549   :  { %3763 = vrcp.f32 %v1900_v46  ;;  %v1901_v48 = vadd.f32 1.0, %v3754_v37  ;;  %v3756_v18 = vpop.eup %3755  ;;  %v4513_v46 = vld [vmem:[#allocation7 + $0xe8] ss:$16 sps:$4 sm:$0xff]   ;;  %v1954_v37 = vunpack.c.l.bf16 %v1950_v47 }
 0x54a   :  { %3765 = vpow2.f32 %v3287_v2  ;;  %v3758_v53 = vpop.eup %3757  ;;  %v4511_v2 = vld [vmem:[#allocation7 + $0xe0] ss:$16 sps:$4 sm:$0xff]  }
 0x54b   :  { %3767 = vrcp.f32 %v1889_v51  ;;  %v3760_v55 = vpop.eup %3759  ;;  %v1914_v21 = vadd.f32 1.0, %v3758_v53  ;;  %v1952_v51 = vld [vmem:[#allocation4 + $0xb0] sm:$0xff] }
 0x54c   :  { %3769 = vrcp.f32 %v1901_v48  ;;  %v1955_v48 = vunpack.c.h.bf16 %v1950_v47  ;;  %v1959_v53 = vunpack.c.h.bf16 %v1952_v51 }
 0x54d   :  { %3771 = vrcp.f32 %v1914_v21 }
 0x54e   :  { %v1967_v21 = vadd.f32 %v1959_v53, %v4139_v43 }
 0x552   :  { %v3762_v50 = vpop.eup %3761 }
 0x553   :  { %v3764_v57 = vpop.eup %3763  ;;  %v1924_v8 = vmul.f32 %v3762_v50, %v3756_v18  ;;  %v1958_v18 = vunpack.c.l.bf16 %v1952_v51  ;;  %v1951_v50 = vld [vmem:[#allocation4 + $0xa8] sm:$0xff] }
 0x554   :  { %v3766_v54 = vpop.eup %3765  ;;  %v1922_v19 = vmul.f32 %v3764_v57, %v4366_v49  ;;  %v1963_v57 = vadd.f32 %v1955_v48, %v4139_v43 }
 0x555   :  { %v3768_v20 = vpop.eup %3767  ;;  %v1915_v25 = vadd.f32 1.0, %v3766_v54 }
 0x556   :  { %v4414_v22 = vadd.f32 %v1924_v8, %v1922_v19  ;;  %v1925_v23 = vmul.f32 %v3768_v20, %v3760_v55  ;;  %v3770_v24 = vpop.eup %3769  ;;  %v1962_v55 = vadd.f32 %v1954_v37, %v4137_v41  ;;  %v1966_v8 = vadd.f32 %v1958_v18, %v4137_v41 }
 0x557   :  { %v1923_v26 = vmul.f32 %v3770_v24, %v4370_v58  ;;  %v3772_v28 = vpop.eup %3771  ;;  %v4423_v58 = vld [vmem:[#allocation7 + $0x4] ss:$16 sps:$4 sm:$0xff]   ;;  %v1957_v20 = vunpack.c.h.bf16 %v1951_v50 }
 0x558   :  { %3773 = vtanh.f32 %v4414_v22  ;;  %2538 = vmatprep.subr.bf16.mxu0 %v4423_v58 }
 0x559   :  { %v4418_v27 = vadd.f32 %v1925_v23, %v1923_v26  ;;  %3775 = vrcp.f32 %v1915_v25  ;;  %v1953_v26 = vld [vmem:[#allocation4 + $0xb8] sm:$0xff]  ;;  %v1965_v47 = vadd.f32 %v1957_v20, %v4145_v56 }
 0x55a   :  { %v1961_v37 = vunpack.c.h.bf16 %v1953_v26  ;;  %v1960_v18 = vunpack.c.l.bf16 %v1953_v26 }
 0x55b   :  { %3777 = vtanh.f32 %v4418_v27 }
 0x562   :  { %v3774_v29 = vpop.eup %3773 }
 0x563   :  { %v3776_v49 = vpop.eup %3775  ;;  %v1930_v31 = vmul.f32 %v3774_v29, %v3772_v28 }
 0x565   :  { %v3778_v30 = vpop.eup %3777 }
 0x566   :  { %v1931_v32 = vmul.f32 %v3778_v30, %v3776_v49 }
 0x568   :  { %v3449_v59 = vpack.c.bf16 %v1931_v32, %v1930_v31  ;;  %v1956_v31 = vunpack.c.l.bf16 %v1951_v50  ;;  %v1968_v50 = vadd.f32 %v1960_v18, %v4147_v63 }
 0x56a   :  { %3450 = vst [vmem:[#allocation9 + $0x20] sm:$0xff] %v3449_v59   ;;  %2196 = vmatmul.mubr.bf16.vlgmr.msra.gmra.mrb[20].mxu0 %v3449_v59  ;;  %2239 = vmatmul.mubr.bf16.vlgmr.msra.gmra.mrb[20].mxu1 %v3449_v59 }
 0x56b   :  { %2570 = vmatprep.mubr.bf16.mxu0 %v4613_v11  ;;  %2613 = vmatprep.mubr.bf16.mxu1 %v4613_v11 }
 0x56c   :  { %2539 = vmatpush1.bf16.msra.mxu0 %v4427_v61  ;;  %2582 = vmatpush1.bf16.msra.mxu1 %v4429_v62 }
 0x56d   :  { %2540 = vmatprep.subr.bf16.mxu0 %v4435_v1  ;;  %2583 = vmatprep.subr.bf16.mxu1 %v4437_v6 }
 0x570   :  { %2541 = vmatpush1.bf16.msra.mxu0 %v4439_v33  ;;  %2584 = vmatpush1.bf16.msra.mxu1 %v4441_v34 }
 0x571   :  { %2542 = vmatprep.subr.bf16.mxu0 %v4447_v35  ;;  %2585 = vmatprep.subr.bf16.mxu1 %v4449_v36 }
 0x574   :  { %2543 = vmatpush1.bf16.msra.mxu0 %v4451_v38  ;;  %2586 = vmatpush1.bf16.msra.mxu1 %v4453_v39 }
 0x575   :  { %2544 = vmatprep.subr.bf16.mxu0 %v4459_v40  ;;  %2587 = vmatprep.subr.bf16.mxu1 %v4461_v42 }
 0x578   :  { %2545 = vmatpush1.bf16.msra.mxu0 %v4463_v44  ;;  %2588 = vmatpush1.bf16.msra.mxu1 %v4465_v45 }
 0x579   :  { %2546 = vmatprep.subr.bf16.mxu0 %v4471_v12  ;;  %2589 = vmatprep.subr.bf16.mxu1 %v4473_v4 }
 0x57c   :  { %2547 = vmatpush1.bf16.msra.mxu0 %v4475_v5  ;;  %2590 = vmatpush1.bf16.msra.mxu1 %v4477_v7 }
 0x57d   :  { %2548 = vmatprep.subr.bf16.mxu0 %v4481_v13  ;;  %2591 = vmatprep.subr.bf16.mxu1 %v4483_v14 }
 0x580   :  { %2549 = vmatpush1.bf16.msra.mxu0 %v4487_v52  ;;  %2592 = vmatpush1.bf16.msra.mxu1 %v4489_v10 }
 0x581   :  { %2550 = vmatprep.subr.bf16.mxu0 %v4493_v3  ;;  %2593 = vmatprep.subr.bf16.mxu1 %v4495_v16 }
 0x584   :  { %2551 = vmatpush1.bf16.msra.mxu0 %v4499_v15  ;;  %2594 = vmatpush1.bf16.msra.mxu1 %v4501_v0 }
 0x585   :  { %2552 = vmatprep.subr.bf16.mxu0 %v4505_v9  ;;  %2595 = vmatprep.subr.bf16.mxu1 %v4507_v17 }
 0x588   :  { %2553 = vmatpush1.bf16.msra.mxu0 %v4511_v2  ;;  %2596 = vmatpush1.bf16.msra.mxu1 %v4513_v46 }
 0x589   :  { %2913 = vmatprep.subr.bf16.mxu0 %v4423_v58  ;;  %2956 = vmatprep.subr.bf16.mxu1 %v4425_v60 }
 0x63d   :  { %v2197_v54 = vpop.f32.mrb[20].mxu0  ;;  %v2240_v19 = vpop.f32.mrb[20].mxu1 }
 0x63e   :  { %v2249_v23 = vadd.f32 %v2197_v54, %v1962_v55  ;;  %v2199_v24 = vpop.f32.mrb[21].mxu0  ;;  %v2242_v25 = vpop.f32.mrb[21].mxu1  ;;  %v1964_v55 = vadd.f32 %v1956_v31, %v4147_v63  ;;  %v1969_v54 = vadd.f32 %v1961_v37, %v4145_v56 }
 0x63f   :  { %v2250_v28 = vadd.f32 %v2199_v24, %v1963_v57  ;;  %v2201_v29 = vpop.f32.mrb[22].mxu0  ;;  %v2244_v49 = vpop.f32.mrb[22].mxu1  ;;  %v2252_v57 = vadd.f32 %v2242_v25, %v1965_v47 }
 0x640   :  { %v3322_v30 = vmul.f32 -1.442695, %v2249_v23  ;;  %v2253_v32 = vadd.f32 %v2201_v29, %v1966_v8  ;;  %v2203_v59 = vpop.f32.mrb[23].mxu0  ;;  %v2246_v58 = vpop.f32.mrb[23].mxu1  ;;  %v2251_v8 = vadd.f32 %v2240_v19, %v1964_v55  ;;  %v2255_v20 = vadd.f32 %v2244_v49, %v1968_v50 }
 0x641   :  { %v3324_v60 = vmul.f32 -1.442695, %v2250_v28  ;;  %v2254_v51 = vadd.f32 %v2203_v59, %v1967_v21  ;;  %v3326_v23 = vmul.f32 -1.442695, %v2252_v57  ;;  %v2256_v24 = vadd.f32 %v2246_v58, %v1969_v54 }
 0x642   :  { %3779 = vpow2.f32 %v3322_v30  ;;  %v3323_v48 = vmul.f32 -1.442695, %v2253_v32 }
 0x643   :  { %3781 = vpow2.f32 %v3324_v60  ;;  %v3325_v53 = vmul.f32 -1.442695, %v2254_v51  ;;  %v3327_v26 = vmul.f32 -1.442695, %v2256_v24 }
 0x644   :  { %3783 = vpow2.f32 %v3323_v48 }
 0x645   :  { %3785 = vpow2.f32 %v3325_v53 }
 0x646   :  { %3787 = vtanh.f32 %v2251_v8 }
 0x647   :  { %3789 = vpow2.f32 %v3326_v23 }
 0x648   :  { %3791 = vtanh.f32 %v2255_v20 }
 0x64c   :  { %v3780_v21 = vpop.eup %3779 }
 0x64d   :  { %v3782_v28 = vpop.eup %3781  ;;  %v2263_v29 = vadd.f32 1.0, %v3780_v21 }
 0x64e   :  { %v2275_v30 = vadd.f32 1.0, %v3782_v28  ;;  %v3784_v31 = vpop.eup %3783 }
 0x64f   :  { %3793 = vrcp.f32 %v2263_v29  ;;  %v2264_v25 = vadd.f32 1.0, %v3784_v31  ;;  %v3786_v32 = vpop.eup %3785 }
 0x650   :  { %3795 = vrcp.f32 %v2275_v30  ;;  %v2276_v59 = vadd.f32 1.0, %v3786_v32  ;;  %v3788_v19 = vpop.eup %3787 }
 0x651   :  { %3797 = vpow2.f32 %v3327_v26  ;;  %v3790_v58 = vpop.eup %3789 }
 0x652   :  { %3799 = vrcp.f32 %v2264_v25  ;;  %v3792_v49 = vpop.eup %3791  ;;  %v2289_v53 = vadd.f32 1.0, %v3790_v58 }
 0x653   :  { %3801 = vrcp.f32 %v2276_v59 }
 0x654   :  { %3803 = vrcp.f32 %v2289_v53 }
 0x659   :  { %v3794_v60 = vpop.eup %3793 }
 0x65a   :  { %v3796_v47 = vpop.eup %3795  ;;  %v2299_v51 = vmul.f32 %v3794_v60, %v3788_v19 }
 0x65b   :  { %v3798_v37 = vpop.eup %3797  ;;  %v2297_v48 = vmul.f32 %v3796_v47, %v4414_v22 }
 0x65c   :  { %v3800_v18 = vpop.eup %3799  ;;  %v2290_v50 = vadd.f32 1.0, %v3798_v37 }
 0x65d   :  { %v4530_v55 = vadd.f32 %v2299_v51, %v2297_v48  ;;  %v2300_v57 = vmul.f32 %v3800_v18, %v3792_v49  ;;  %v3802_v54 = vpop.eup %3801 }
 0x65e   :  { %v2298_v8 = vmul.f32 %v3802_v54, %v4418_v27  ;;  %v3804_v24 = vpop.eup %3803  ;;  %v2327_v27 = vld [vmem:[#allocation4 + $0xd0] sm:$0xff] }
 0x65f   :  { %3805 = vtanh.f32 %v4530_v55 }
 0x660   :  { %v4534_v23 = vadd.f32 %v2300_v57, %v2298_v8  ;;  %3807 = vrcp.f32 %v2290_v50 }
 0x662   :  { %3809 = vtanh.f32 %v4534_v23 }
 0x669   :  { %v3806_v20 = vpop.eup %3805 }
 0x66a   :  { %v3808_v22 = vpop.eup %3807  ;;  %v2305_v28 = vmul.f32 %v3806_v20, %v3804_v24 }
 0x66c   :  { %v3810_v21 = vpop.eup %3809 }
 0x66d   :  { %v2306_v29 = vmul.f32 %v3810_v21, %v3808_v22 }
 0x66f   :  { %v3454_v26 = vpack.c.bf16 %v2306_v29, %v2305_v28 }
 0x671   :  { %3455 = vst [vmem:[#allocation9 + $0x28] sm:$0xff] %v3454_v26   ;;  %2571 = vmatmul.mubr.bf16.vlgmr.msra.gmra.mrb[24].mxu0 %v3454_v26  ;;  %2614 = vmatmul.mubr.bf16.vlgmr.msra.gmra.mrb[24].mxu1 %v3454_v26 }
 0x672   :  { %2914 = vmatpush1.bf16.msra.mxu0 %v4427_v61  ;;  %2957 = vmatpush1.bf16.msra.mxu1 %v4429_v62 }
 0x673   :  { %2915 = vmatprep.subr.bf16.mxu0 %v4435_v1  ;;  %2958 = vmatprep.subr.bf16.mxu1 %v4437_v6  ;;  %v2333_v1 = vunpack.c.l.bf16 %v2327_v27  ;;  %v2334_v6 = vunpack.c.h.bf16 %v2327_v27 }
 0x674   :  { %2945 = vmatprep.mubr.bf16.mxu0 %v4613_v11  ;;  %2988 = vmatprep.mubr.bf16.mxu1 %v4613_v11  ;;  %v2325_v11 = vld [vmem:[#allocation4 + $0xc0] sm:$0xff] }
 0x675   :  { %v2329_v61 = vunpack.c.l.bf16 %v2325_v11  ;;  %v2330_v62 = vunpack.c.h.bf16 %v2325_v11 }
 0x676   :  { %2916 = vmatpush1.bf16.msra.mxu0 %v4439_v33  ;;  %2959 = vmatpush1.bf16.msra.mxu1 %v4441_v34  ;;  %v2326_v34 = vld [vmem:[#allocation4 + $0xc8] sm:$0xff] }
 0x677   :  { %2917 = vmatprep.subr.bf16.mxu0 %v4447_v35  ;;  %2960 = vmatprep.subr.bf16.mxu1 %v4449_v36  ;;  %v2337_v33 = vadd.f32 %v2329_v61, %v4137_v41  ;;  %v2338_v35 = vadd.f32 %v2330_v62, %v4139_v43  ;;  %v2341_v36 = vadd.f32 %v2333_v1, %v4137_v41 }
 0x67a   :  { %2918 = vmatpush1.bf16.msra.mxu0 %v4451_v38  ;;  %2961 = vmatpush1.bf16.msra.mxu1 %v4453_v39 }
 0x67b   :  { %2919 = vmatprep.subr.bf16.mxu0 %v4459_v40  ;;  %2962 = vmatprep.subr.bf16.mxu1 %v4461_v42  ;;  %v2332_v40 = vunpack.c.h.bf16 %v2326_v34  ;;  %v2342_v42 = vadd.f32 %v2334_v6, %v4139_v43 }
 0x67e   :  { %2920 = vmatpush1.bf16.msra.mxu0 %v4463_v44  ;;  %2963 = vmatpush1.bf16.msra.mxu1 %v4465_v45 }
 0x67f   :  { %2921 = vmatprep.subr.bf16.mxu0 %v4471_v12  ;;  %2964 = vmatprep.subr.bf16.mxu1 %v4473_v4  ;;  %v2328_v4 = vld [vmem:[#allocation4 + $0xd8] sm:$0xff] }
 0x682   :  { %2922 = vmatpush1.bf16.msra.mxu0 %v4475_v5  ;;  %2965 = vmatpush1.bf16.msra.mxu1 %v4477_v7 }
 0x683   :  { %2923 = vmatprep.subr.bf16.mxu0 %v4481_v13  ;;  %2966 = vmatprep.subr.bf16.mxu1 %v4483_v14 }
 0x686   :  { %2924 = vmatpush1.bf16.msra.mxu0 %v4487_v52  ;;  %2967 = vmatpush1.bf16.msra.mxu1 %v4489_v10  ;;  %v2331_v52 = vunpack.c.l.bf16 %v2326_v34 }
 0x687   :  { %2925 = vmatprep.subr.bf16.mxu0 %v4493_v3  ;;  %2968 = vmatprep.subr.bf16.mxu1 %v4495_v16 }
 0x688   :  { %v2339_v31 = vadd.f32 %v2331_v52, %v4147_v63 }
 0x68a   :  { %2926 = vmatpush1.bf16.msra.mxu0 %v4499_v15  ;;  %2969 = vmatpush1.bf16.msra.mxu1 %v4501_v0  ;;  %v2340_v0 = vadd.f32 %v2332_v40, %v4145_v56 }
 0x68b   :  { %2927 = vmatprep.subr.bf16.mxu0 %v4505_v9  ;;  %2970 = vmatprep.subr.bf16.mxu1 %v4507_v17  ;;  %v2336_v17 = vunpack.c.h.bf16 %v2328_v4 }
 0x68d   :  { %v2344_v32 = vadd.f32 %v2336_v17, %v4145_v56 }
 0x68e   :  { %2928 = vmatpush1.bf16.msra.mxu0 %v4511_v2  ;;  %2971 = vmatpush1.bf16.msra.mxu1 %v4513_v46  ;;  %v2335_v46 = vunpack.c.l.bf16 %v2328_v4 }
 0x690   :  { %v2343_v59 = vadd.f32 %v2335_v46, %v4147_v63 }
 0x744   :  { %v2572_v38 = vpop.f32.mrb[24].mxu0  ;;  %v2615_v39 = vpop.f32.mrb[24].mxu1 }
 0x745   :  { %v2624_v44 = vadd.f32 %v2572_v38, %v2337_v33  ;;  %v2574_v45 = vpop.f32.mrb[25].mxu0  ;;  %v2617_v12 = vpop.f32.mrb[25].mxu1  ;;  %v2626_v19 = vadd.f32 %v2615_v39, %v2339_v31 }
 0x746   :  { %v2625_v5 = vadd.f32 %v2574_v45, %v2338_v35  ;;  %v2576_v7 = vpop.f32.mrb[26].mxu0  ;;  %v2619_v13 = vpop.f32.mrb[26].mxu1  ;;  %v2627_v25 = vadd.f32 %v2617_v12, %v2340_v0 }
 0x747   :  { %v3362_v14 = vmul.f32 -1.442695, %v2624_v44  ;;  %v2628_v10 = vadd.f32 %v2576_v7, %v2341_v36  ;;  %v2578_v3 = vpop.f32.mrb[27].mxu0  ;;  %v2621_v16 = vpop.f32.mrb[27].mxu1  ;;  %v2630_v60 = vadd.f32 %v2619_v13, %v2343_v59  ;;  %v2700_v44 = vld [vmem:[#allocation4 + $0xe0] sm:$0xff]  ;;  %v2701_v13 = vld [vmem:[#allocation4 + $0xe8] sm:$0xff] }
 0x748   :  { %v3364_v15 = vmul.f32 -1.442695, %v2625_v5  ;;  %v2629_v9 = vadd.f32 %v2578_v3, %v2342_v42  ;;  %v3366_v58 = vmul.f32 -1.442695, %v2627_v25  ;;  %v2631_v49 = vadd.f32 %v2621_v16, %v2344_v32 }
 0x749   :  { %3811 = vpow2.f32 %v3362_v14  ;;  %v3363_v2 = vmul.f32 -1.442695, %v2628_v10  ;;  %v2704_v45 = vunpack.c.l.bf16 %v2700_v44  ;;  %v2705_v12 = vunpack.c.h.bf16 %v2700_v44 }
 0x74a   :  { %3813 = vpow2.f32 %v3364_v15  ;;  %v3365_v30 = vmul.f32 -1.442695, %v2629_v9  ;;  %v3367_v48 = vmul.f32 -1.442695, %v2631_v49  ;;  %v2707_v16 = vunpack.c.h.bf16 %v2701_v13 }
 0x74b   :  { %3815 = vpow2.f32 %v3363_v2  ;;  %v2712_v7 = vadd.f32 %v2704_v45, %v4137_v41  ;;  %v2713_v14 = vadd.f32 %v2705_v12, %v4139_v43  ;;  %v2703_v2 = vld [vmem:[#allocation4 + $0xf8] sm:$0xff]  ;;  %v2706_v32 = vunpack.c.l.bf16 %v2701_v13 }
 0x74c   :  { %3817 = vpow2.f32 %v3365_v30 }
 0x74d   :  { %3819 = vtanh.f32 %v2626_v19 }
 0x74e   :  { %3821 = vpow2.f32 %v3366_v58 }
 0x74f   :  { %3823 = vtanh.f32 %v2630_v60 }
 0x753   :  { %v3812_v47 = vpop.eup %3811 }
 0x754   :  { %v3814_v51 = vpop.eup %3813  ;;  %v2638_v37 = vadd.f32 1.0, %v3812_v47  ;;  %v2711_v47 = vunpack.c.h.bf16 %v2703_v2 }
 0x755   :  { %v2650_v18 = vadd.f32 1.0, %v3814_v51  ;;  %v3816_v53 = vpop.eup %3815 }
 0x756   :  { %3825 = vrcp.f32 %v2638_v37  ;;  %v2639_v57 = vadd.f32 1.0, %v3816_v53  ;;  %v3818_v54 = vpop.eup %3817  ;;  %v2719_v53 = vadd.f32 %v2711_v47, %v4145_v56 }
 0x757   :  { %3827 = vrcp.f32 %v2650_v18  ;;  %v2651_v50 = vadd.f32 1.0, %v3818_v54  ;;  %v3820_v8 = vpop.eup %3819 }
 0x758   :  { %3829 = vpow2.f32 %v3367_v48  ;;  %v3822_v24 = vpop.eup %3821  ;;  %v2714_v48 = vadd.f32 %v2706_v32, %v4147_v63 }
 0x759   :  { %3831 = vrcp.f32 %v2639_v57  ;;  %v3824_v20 = vpop.eup %3823  ;;  %v2664_v27 = vadd.f32 1.0, %v3822_v24 }
 0x75a   :  { %3833 = vrcp.f32 %v2651_v50 }
 0x75b   :  { %3835 = vrcp.f32 %v2664_v27 }
 0x760   :  { %v3826_v22 = vpop.eup %3825 }
 0x761   :  { %v3828_v21 = vpop.eup %3827  ;;  %v2674_v28 = vmul.f32 %v3826_v22, %v3820_v8 }
 0x762   :  { %v3830_v29 = vpop.eup %3829  ;;  %v2672_v26 = vmul.f32 %v3828_v21, %v4530_v55 }
 0x763   :  { %v3832_v11 = vpop.eup %3831  ;;  %v2665_v6 = vadd.f32 1.0, %v3830_v29 }
 0x764   :  { %v4578_v61 = vadd.f32 %v2674_v28, %v2672_v26  ;;  %v2675_v62 = vmul.f32 %v3832_v11, %v3824_v20  ;;  %v3834_v1 = vpop.eup %3833 }
 0x765   :  { %v2673_v33 = vmul.f32 %v3834_v1, %v4534_v23  ;;  %v3836_v35 = vpop.eup %3835  ;;  %v2702_v23 = vld [vmem:[#allocation4 + $0xf0] sm:$0xff] }
 0x766   :  { %3837 = vtanh.f32 %v4578_v61  ;;  %v2708_v4 = vunpack.c.l.bf16 %v2702_v23  ;;  %v2709_v5 = vunpack.c.h.bf16 %v2702_v23 }
 0x767   :  { %v4582_v34 = vadd.f32 %v2675_v62, %v2673_v33  ;;  %3839 = vrcp.f32 %v2665_v6 }
 0x768   :  { %v2716_v52 = vadd.f32 %v2708_v4, %v4137_v41  ;;  %v2717_v15 = vadd.f32 %v2709_v5, %v4139_v43  ;;  %v2715_v41 = vadd.f32 %v2707_v16, %v4145_v56  ;;  %v2710_v43 = vunpack.c.l.bf16 %v2703_v2 }
 0x769   :  { %3841 = vtanh.f32 %v4582_v34 }
 0x76a   :  { %v2718_v57 = vadd.f32 %v2710_v43, %v4147_v63 }
 0x770   :  { %v3838_v36 = vpop.eup %3837 }
 0x771   :  { %v3840_v55 = vpop.eup %3839  ;;  %v2680_v39 = vmul.f32 %v3838_v36, %v3836_v35 }
 0x773   :  { %v3842_v38 = vpop.eup %3841 }
 0x774   :  { %v2681_v40 = vmul.f32 %v3842_v38, %v3840_v55 }
 0x776   :  { %v3459_v42 = vpack.c.bf16 %v2681_v40, %v2680_v39 }
 0x778   :  { %3460 = vst [vmem:[#allocation9 + $0x30] sm:$0xff] %v3459_v42   ;;  %2946 = vmatmul.mubr.bf16.vlgmr.msra.gmra.mrb[28].mxu0 %v3459_v42  ;;  %2989 = vmatmul.mubr.bf16.vlgmr.msra.gmra.mrb[28].mxu1 %v3459_v42 }
 0x84b   :  { %v2947_v10 = vpop.f32.mrb[28].mxu0  ;;  %v2990_v3 = vpop.f32.mrb[28].mxu1 }
 0x84c   :  { %v2999_v0 = vadd.f32 %v2947_v10, %v2712_v7  ;;  %v2949_v9 = vpop.f32.mrb[29].mxu0  ;;  %v2992_v17 = vpop.f32.mrb[29].mxu1  ;;  %v3001_v54 = vadd.f32 %v2990_v3, %v2714_v48 }
 0x84d   :  { %v3000_v46 = vadd.f32 %v2949_v9, %v2713_v14  ;;  %v2951_v30 = vpop.f32.mrb[30].mxu0  ;;  %v2994_v31 = vpop.f32.mrb[30].mxu1  ;;  %v3002_v18 = vadd.f32 %v2992_v17, %v2715_v41 }
 0x84e   :  { %v3402_v25 = vmul.f32 -1.442695, %v2999_v0  ;;  %v3003_v59 = vadd.f32 %v2951_v30, %v2716_v52  ;;  %v2953_v19 = vpop.f32.mrb[31].mxu0  ;;  %v2996_v58 = vpop.f32.mrb[31].mxu1  ;;  %v3005_v24 = vadd.f32 %v2994_v31, %v2718_v57 }
 0x84f   :  { %v3404_v49 = vmul.f32 -1.442695, %v3000_v46  ;;  %v3004_v60 = vadd.f32 %v2953_v19, %v2717_v15  ;;  %v3406_v50 = vmul.f32 -1.442695, %v3002_v18  ;;  %v3006_v8 = vadd.f32 %v2996_v58, %v2719_v53 }
 0x850   :  { %3843 = vpow2.f32 %v3402_v25  ;;  %v3403_v51 = vmul.f32 -1.442695, %v3003_v59 }
 0x851   :  { %3845 = vpow2.f32 %v3404_v49  ;;  %v3405_v37 = vmul.f32 -1.442695, %v3004_v60  ;;  %v3407_v28 = vmul.f32 -1.442695, %v3006_v8 }
 0x852   :  { %3847 = vpow2.f32 %v3403_v51 }
 0x853   :  { %3849 = vpow2.f32 %v3405_v37 }
 0x854   :  { %3851 = vtanh.f32 %v3001_v54 }
 0x855   :  { %3853 = vpow2.f32 %v3406_v50 }
 0x856   :  { %3855 = vtanh.f32 %v3005_v24 }
 0x85a   :  { %v3844_v20 = vpop.eup %3843 }
 0x85b   :  { %v3846_v22 = vpop.eup %3845  ;;  %v3013_v21 = vadd.f32 1.0, %v3844_v20 }
 0x85c   :  { %v3025_v29 = vadd.f32 1.0, %v3846_v22  ;;  %v3848_v26 = vpop.eup %3847 }
 0x85d   :  { %3857 = vrcp.f32 %v3013_v21  ;;  %v3014_v11 = vadd.f32 1.0, %v3848_v26  ;;  %v3850_v56 = vpop.eup %3849 }
 0x85e   :  { %3859 = vrcp.f32 %v3025_v29  ;;  %v3026_v63 = vadd.f32 1.0, %v3850_v56  ;;  %v3852_v27 = vpop.eup %3851 }
 0x85f   :  { %3861 = vpow2.f32 %v3407_v28  ;;  %v3854_v62 = vpop.eup %3853 }
 0x860   :  { %3863 = vrcp.f32 %v3014_v11  ;;  %v3856_v1 = vpop.eup %3855  ;;  %v3039_v36 = vadd.f32 1.0, %v3854_v62 }
 0x861   :  { %3865 = vrcp.f32 %v3026_v63 }
 0x862   :  { %3867 = vrcp.f32 %v3039_v36 }
 0x867   :  { %v3858_v6 = vpop.eup %3857 }
 0x868   :  { %v3860_v33 = vpop.eup %3859  ;;  %v3049_v35 = vmul.f32 %v3858_v6, %v3852_v27 }
 0x869   :  { %v3862_v55 = vpop.eup %3861  ;;  %v3047_v38 = vmul.f32 %v3860_v33, %v4578_v61 }
 0x86a   :  { %v3864_v39 = vpop.eup %3863  ;;  %v3040_v23 = vadd.f32 1.0, %v3862_v55 }
 0x86b   :  { %v3051_v40 = vadd.f32 %v3049_v35, %v3047_v38  ;;  %v3050_v42 = vmul.f32 %v3864_v39, %v3856_v1  ;;  %v3866_v44 = vpop.eup %3865 }
 0x86c   :  { %v3048_v45 = vmul.f32 %v3866_v44, %v4582_v34  ;;  %v3868_v4 = vpop.eup %3867 }
 0x86d   :  { %3869 = vtanh.f32 %v3051_v40 }
 0x86e   :  { %v3052_v12 = vadd.f32 %v3050_v42, %v3048_v45  ;;  %3871 = vrcp.f32 %v3040_v23 }
 0x870   :  { %3873 = vtanh.f32 %v3052_v12 }
 0x877   :  { %v3870_v5 = vpop.eup %3869 }
 0x878   :  { %v3055_v7 = vmul.f32 %v3870_v5, %v3868_v4  ;;  %v3872_v13 = vpop.eup %3871 }
 0x87a   :  { %v3874_v14 = vpop.eup %3873 }
 0x87b   :  { %v3056_v61 = vmul.f32 %v3874_v14, %v3872_v13 }
 0x87d   :  { %v3464_v52 = vpack.c.bf16 %v3056_v61, %v3055_v7 }
 0x87f   :  { %3465 = vst [vmem:[#allocation9 + $0x38] sm:$0xff] %v3464_v52  }
 0x880   :  { %3930 = shalt.err (!%p3927_p6)
}
 0x881   :  { %s3931_s15 = scalar_lea.hbm %s4610_s3, 1024 }
 0x882   :  { %p3932_p7 = scmp.ne.s32.totalorder %s4610_s3, %s3931_s15  ;;  %p3935_p8 = scmp.lt.u32.totalorder %s3931_s15, %s4610_s3 }
 0x884   :  { %p3937_p9 = pnand %p3935_p8, %p3932_p7 }
 0x886   :  { %3940 = shalt.err (!%p3937_p9)
}
 0x887   :  { %s3954_s20 = smov 64   ;;  %s3955_s21 = smov 4  }
 0x888   :  { %3083 = dma.vmem_to_hbm [thread:$0]  %s3078_s11, 1024, %s4610_s3, [#allocation6], %s3954_s20, %s3954_s20, %s3955_s21  }
 0x889   :  { %3945 = dma.done.wait [#allocation6], 1024  }
 0x88a   :  { %3946 = vsyncadd [#allocation6], 4294966272 }
 0x88b   :  { %3087 = vsyncpa [#allocation5], 1 }
 0x88c   :  { %3088 = vsyncpa [#allocation8], 1 }
 0x88d   :  { %3089 = vsyncpa [#allocation6], 1 }

</bundles_post_ra>
